<compile_context>
chip_gen: v5e
topology: v5e:2x2
jax: 0.10.0
libtpu: 0.0.40
codegen_flags: <defaults>
</compile_context>

<pallas_src>
import jax
import jax.numpy as jnp
from jax.experimental import pallas as pl
from jax.experimental.pallas import tpu as pltpu

HIDDEN_DIM = 1024                            # forced by PRETRAINED_MODELS['pointnet']
EMBED_DIM = 512
PN_DIMS = (3, 64, 64, 64, 128, HIDDEN_DIM)   # standard PointNet 1x1-conv stack
BN_EPS = 1e-5
PROJ_TK = 2048                               # projector reduction tile (fits all gens)


def _round_up(x, m):
    return ((x + m - 1) // m) * m


def _round_down(x, m):
    return (x // m) * m


# --------------------------------------------------------------------------
# Kernel 1: PointNet encoder
#   5 x (1x1 conv == matmul, folded BN, ReLU)  ->  global max-pool over points
# Grid: (split, tile)  -- "split" is a parallel axis over halves of the points
# axis (both v7x TCs), "tile" iterates point tiles within a split with a
# running-max f32 accumulator (max-pool is associative -> exact).
# --------------------------------------------------------------------------
def _pointnet_kernel(pts_ref,
                     w1, b1, w2, b2, w3, b3, w4, b4, w5, b5,
                     out_ref, acc_ref):
    n = pl.program_id(1)

    @pl.when(n == 0)
    def _init():
        # All layers end in ReLU (>= 0), so 0 is an exact max-pool identity here.
        acc_ref[...] = jnp.zeros_like(acc_ref)

    B, tn, C = pts_ref.shape
    p = pts_ref[...].astype(jnp.float32).reshape(B * tn, C)          # (B*tn, 3)

    # Layer 1 (K=3): padded MXU matmul would waste >97% of the systolic array,
    # so do it on the VPU as a broadcast multiply-add.
    w1f = w1[...].astype(jnp.float32)                                # (3, 64)
    h = (p[:, 0:1] * w1f[0:1, :]
         + p[:, 1:2] * w1f[1:2, :]
         + p[:, 2:3] * w1f[2:3, :])
    h = jnp.maximum(h + b1[...], 0.0)                                # (B*tn, 64)

    # Layers 2..5: bf16 matmuls on the MXU with f32 accumulation.
    for w_ref, b_ref in ((w2, b2), (w3, b3), (w4, b4), (w5, b5)):
        h = jnp.dot(h.astype(jnp.bfloat16), w_ref[...],
                    preferred_element_type=jnp.float32)
        h = jnp.maximum(h + b_ref[...], 0.0)

    D = h.shape[-1]
    # running global max pool over the points axis (== torch.max(..., dim=2) in NCW)
    acc_ref[...] = jnp.maximum(acc_ref[...],
                               jnp.max(h.reshape(B, tn, D), axis=1))

    @pl.when(n == pl.num_programs(1) - 1)
    def _finalize():
        out_ref[0] = acc_ref[...].astype(out_ref.dtype)


def pointnet_encoder(points, enc_params, *, pts_per_tile_budget=2048):
    """points: (B, N, 3) f32.  Returns (B, HIDDEN_DIM) bf16 global features."""
    B, N, C = points.shape
    assert N > 0, "PointNet global max-pool requires at least one point"
    assert C == 3

    # VMEM-aware tile of the points axis: layer-5 f32 activations alone are
    # B*tn*HIDDEN_DIM*4 bytes, so keep B*tn around ~2048 points per grid step
    # (safe on v7x's 64 MiB VMEM, comfortable on v5e/v6e's 128 MiB).
    tn_cap = max(8, _round_down(max(pts_per_tile_budget // B, 8), 8))
    tn = min(tn_cap, _round_up(N, 8))
    n_tiles = -(-N // tn)
    nsplit = 2 if n_tiles >= 2 else 1          # leading parallel axis -> both v7x TCs
    n_tiles = _round_up(n_tiles, nsplit)
    tiles_per_split = n_tiles // nsplit
    n_pad = n_tiles * tn
    if n_pad != N:
        # Pad by repeating an existing point: duplicates never change the max-pool.
        pad = jnp.broadcast_to(points[:, :1, :], (B, n_pad - N, C))
        points = jnp.concatenate([points, pad], axis=1)

    flat = []
    w_specs = []
    for w, b in enc_params:
        flat += [w, b]
        w_specs += [
            pl.BlockSpec(w.shape, lambda c, n: (0, 0)),
            pl.BlockSpec(b.shape, lambda c, n: (0, 0)),
        ]

    out = pl.pallas_call(
        _pointnet_kernel,
        out_shape=jax.ShapeDtypeStruct((nsplit, B, HIDDEN_DIM), jnp.bfloat16),
        grid_spec=pltpu.PrefetchScalarGridSpec(
            num_scalar_prefetch=0,
            grid=(nsplit, tiles_per_split),
            in_specs=[pl.BlockSpec(
                          (B, tn, C),
                          lambda c, n, T=tiles_per_split: (0, c * T + n, 0))]
                     + w_specs,
            out_specs=pl.BlockSpec((1, B, HIDDEN_DIM), lambda c, n: (c, 0, 0)),
            scratch_shapes=[pltpu.VMEM((B, HIDDEN_DIM), jnp.float32)],
        ),
        compiler_params=pltpu.CompilerParams(
            dimension_semantics=("parallel", "arbitrary"),
            vmem_limit_bytes=48 * 1024 * 1024,
        ),
    )(points, *flat)

    # Combine per-split running maxes (exact; cheap (nsplit, B, H) reduction).
    return jnp.max(out, axis=0)


# --------------------------------------------------------------------------
# Kernel 2: projector MLP  (Linear(H -> 4H) + ReLU + Linear(4H -> E))
# The 4H hidden dim is the reduction grid axis (2 steps at tk=2048).  Weights
# are int8 with per-output-channel f32 scales; W1 is pre-tiled in HBM as
# (4H//tk, H, tk) so each grid step streams one contiguous chunk.  Dequant to
# bf16 in-kernel, dot on the MXU, scales applied in the f32 epilogue,
# accumulate in f32 VMEM scratch.
# --------------------------------------------------------------------------
def _projector_kernel(feats_ref, w1_ref, s1_ref, b1_ref, w2_ref, s2_ref, b2_ref,
                      out_ref, acc_ref):
    k = pl.program_id(0)

    @pl.when(k == 0)
    def _init():
        acc_ref[...] = jnp.zeros_like(acc_ref)

    # Layer 1 chunk: (B, H) bf16 x (H, tk) int8->bf16, per-column scale in f32.
    w1 = w1_ref[...].astype(jnp.bfloat16)                       # dequant (unscaled)
    h = jnp.dot(feats_ref[...], w1,
                preferred_element_type=jnp.float32)             # (B, tk) f32
    h = jnp.maximum(h * s1_ref[...] + b1_ref[...], 0.0)

    # Layer 2 partial sum: per-output-channel scale factors out of the k-sum.
    w2 = w2_ref[...].astype(jnp.bfloat16)
    acc_ref[...] += jnp.dot(h.astype(jnp.bfloat16), w2,
                            preferred_element_type=jnp.float32)  # (B, E) f32

    @pl.when(k == pl.num_programs(0) - 1)
    def _finalize():
        out_ref[...] = (acc_ref[...] * s2_ref[...] + b2_ref[...]).astype(out_ref.dtype)


def projector(feats, w1q_tiled, s1, b1, w2q, s2, b2):
    """feats: (B, H) bf16.  w1q_tiled: (H4//tk, H, tk) int8.  Returns (B, E) f32."""
    B, H = feats.shape
    kt, h_, tk = w1q_tiled.shape
    H4, E = w2q.shape
    assert h_ == H and kt * tk == H4
    assert s1.shape == (1, H4) and b1.shape == (1, H4)
    assert s2.shape == (1, E) and b2.shape == (1, E)
    if feats.dtype != jnp.bfloat16:
        feats = feats.astype(jnp.bfloat16)

    return pl.pallas_call(
        _projector_kernel,
        out_shape=jax.ShapeDtypeStruct((B, E), jnp.float32),
        grid_spec=pltpu.PrefetchScalarGridSpec(
            num_scalar_prefetch=0,
            grid=(kt,),
            in_specs=[
                pl.BlockSpec((B, H), lambda k: (0, 0)),            # feats (resident)
                pl.BlockSpec((None, H, tk), lambda k: (k, 0, 0)),  # contiguous W1 chunk
                pl.BlockSpec((1, tk), lambda k: (0, k)),           # s1 chunk
                pl.BlockSpec((1, tk), lambda k: (0, k)),           # b1 chunk
                pl.BlockSpec((tk, E), lambda k: (k, 0)),           # W2 row block (contig)
                pl.BlockSpec((1, E), lambda k: (0, 0)),            # s2
                pl.BlockSpec((1, E), lambda k: (0, 0)),            # b2
            ],
            out_specs=pl.BlockSpec((B, E), lambda k: (0, 0)),
            scratch_shapes=[pltpu.VMEM((B, E), jnp.float32)],
        ),
        compiler_params=pltpu.CompilerParams(
            dimension_semantics=("arbitrary",),
            vmem_limit_bytes=32 * 1024 * 1024,   # ~12 MiB working set; > v5e 16 MiB default
        ),
    )(feats, w1q_tiled, s1, b1, w2q, s2, b2)


# --------------------------------------------------------------------------
# Deterministic parameter init (synthetic; no checkpoint load).
# --------------------------------------------------------------------------
def _quantize_per_col(w):
    """Symmetric per-output-channel int8 quantization. Returns (int8, f32 scale (1, cols))."""
    amax = jnp.max(jnp.abs(w), axis=0, keepdims=True)
    scale = jnp.maximum(amax, 1e-8) / 127.0
    q = jnp.clip(jnp.round(w / scale), -127, 127).astype(jnp.int8)
    return q, scale.astype(jnp.float32)


def init_params(key, *, tk=PROJ_TK):
    enc = []
    for i in range(5):
        cin, cout = PN_DIMS[i], PN_DIMS[i + 1]
        key, kw, kb, kg, kbt, km, kv = jax.random.split(key, 7)
        w = jax.random.normal(kw, (cin, cout), jnp.float32) * (2.0 / cin) ** 0.5
        b = jax.random.normal(kb, (cout,), jnp.float32) * 0.01
        gamma = 1.0 + 0.1 * jax.random.normal(kg, (cout,), jnp.float32)
        beta = 0.1 * jax.random.normal(kbt, (cout,), jnp.float32)
        mean = 0.01 * jax.random.normal(km, (cout,), jnp.float32)
        var = 1.0 + 0.1 * jax.random.uniform(kv, (cout,), jnp.float32)
        # fold eval-mode BatchNorm1d into the 1x1 conv:
        #   y = gamma * (W x + b - mean) / sqrt(var + eps) + beta
        scale = gamma / jnp.sqrt(var + BN_EPS)
        w_eff = (w * scale[None, :]).astype(jnp.bfloat16)
        b_eff = ((b - mean) * scale + beta)[None, :]          # (1, cout) f32
        enc.append((w_eff, b_eff))

    key, k1, k2, k3, k4 = jax.random.split(key, 5)
    H, H4, E = HIDDEN_DIM, HIDDEN_DIM * 4, EMBED_DIM
    assert H4 % tk == 0
    pw1 = jax.random.normal(k1, (H, H4), jnp.float32) * (2.0 / H) ** 0.5
    pb1 = (jax.random.normal(k2, (H4,), jnp.float32) * 0.01)[None, :]
    pw2 = jax.random.normal(k3, (H4, E), jnp.float32) * (1.0 / H4) ** 0.5
    pb2 = (jax.random.normal(k4, (E,), jnp.float32) * 0.01)[None, :]

    # Int8 weight compression for the bandwidth-bound projector (per-output-
    # channel scales, dequantized to bf16 inside the kernel on every gen).
    w1q, s1 = _quantize_per_col(pw1)                          # (H, H4) i8, (1, H4) f32
    w2q, s2 = _quantize_per_col(pw2)                          # (H4, E) i8, (1, E) f32

    # Pre-tile W1 so each projector grid step's (H, tk) chunk is contiguous in HBM.
    kt = H4 // tk
    w1q_tiled = jnp.transpose(w1q.reshape(H, kt, tk), (1, 0, 2))   # (kt, H, tk) int8
    return {"encoder": enc, "projector": (w1q_tiled, s1, pb1, w2q, s2, pb2)}


def mesh_data_model_forward(points, params):
    feats = pointnet_encoder(points, params["encoder"])       # (B, H) bf16
    # nn.Dropout(0.1) is the identity at inference (eval mode).
    # TODO(synk): training-mode stochastic dropout not implemented.
    return projector(feats, *params["projector"])              # (B, E) f32


if __name__ == "__main__":
    key = jax.random.PRNGKey(0)
    key, kp = jax.random.split(key)
    B, N = 2, 64
    points = jax.random.normal(kp, (B, N, 3), jnp.float32)   # "bnc" layout
    params = init_params(key)

    emb = mesh_data_model_forward(points, params)
    emb = jax.block_until_ready(emb)
    assert emb.shape == (B, EMBED_DIM) and emb.dtype == jnp.float32
    assert bool(jnp.all(jnp.isfinite(emb)))
    print("KERNEL_OK")
</pallas_src>

<mosaic_0001>
module attributes {stable_mosaic.version = 11 : i64} {
  func.func @_pointnet_kernel(%arg0: i32, %arg1: i32, %arg2: memref<2x64x3xf32, #tpu.memory_space<vmem>>, %arg3: memref<3x64xbf16, #tpu.memory_space<vmem>>, %arg4: memref<1x64xf32, #tpu.memory_space<vmem>>, %arg5: memref<64x64xbf16, #tpu.memory_space<vmem>>, %arg6: memref<1x64xf32, #tpu.memory_space<vmem>>, %arg7: memref<64x64xbf16, #tpu.memory_space<vmem>>, %arg8: memref<1x64xf32, #tpu.memory_space<vmem>>, %arg9: memref<64x128xbf16, #tpu.memory_space<vmem>>, %arg10: memref<1x128xf32, #tpu.memory_space<vmem>>, %arg11: memref<128x1024xbf16, #tpu.memory_space<vmem>>, %arg12: memref<1x1024xf32, #tpu.memory_space<vmem>>, %arg13: memref<1x2x1024xbf16, #tpu.memory_space<vmem>>, %arg14: memref<2x1024xf32, #tpu.memory_space<vmem>>) attributes {dimension_semantics = [#tpu.dimension_semantics<parallel>, #tpu.dimension_semantics<arbitrary>], iteration_bounds = array<i64: 1, 1>, scalar_prefetch = 0 : i64, scratch_operands = 1 : i64, tpu.core_type = #tpu.core_type<tc>, window_params = [{transform_indices = @transform_0, window_bounds = array<i64: 2, 64, 3>}, {pipeline_mode = #tpu.pipeline_mode<synchronous>, transform_indices = @transform_1, window_bounds = array<i64: 3, 64>}, {pipeline_mode = #tpu.pipeline_mode<synchronous>, transform_indices = @transform_2, window_bounds = array<i64: 1, 64>}, {pipeline_mode = #tpu.pipeline_mode<synchronous>, transform_indices = @transform_3, window_bounds = array<i64: 64, 64>}, {pipeline_mode = #tpu.pipeline_mode<synchronous>, transform_indices = @transform_4, window_bounds = array<i64: 1, 64>}, {pipeline_mode = #tpu.pipeline_mode<synchronous>, transform_indices = @transform_5, window_bounds = array<i64: 64, 64>}, {pipeline_mode = #tpu.pipeline_mode<synchronous>, transform_indices = @transform_6, window_bounds = array<i64: 1, 64>}, {pipeline_mode = #tpu.pipeline_mode<synchronous>, transform_indices = @transform_7, window_bounds = array<i64: 64, 128>}, {pipeline_mode = #tpu.pipeline_mode<synchronous>, transform_indices = @transform_8, window_bounds = array<i64: 1, 128>}, {pipeline_mode = #tpu.pipeline_mode<synchronous>, transform_indices = @transform_9, window_bounds = array<i64: 128, 1024>}, {pipeline_mode = #tpu.pipeline_mode<synchronous>, transform_indices = @transform_10, window_bounds = array<i64: 1, 1024>}, {transform_indices = @transform_11, window_bounds = array<i64: 1, 2, 1024>}]} {
    %c0_i32 = arith.constant 0 : i32
    %0 = arith.cmpi eq, %arg1, %c0_i32 : i32
    %1 = arith.extui %0 : i1 to i32
    %c0_i32_0 = arith.constant 0 : i32
    %2 = arith.cmpi ne, %1, %c0_i32_0 : i32
    scf.if %2 {
      %cst_38 = arith.constant 0.000000e+00 : f32
      %69 = vector.broadcast %cst_38 : f32 to vector<2x1024xf32>
      %c0_39 = arith.constant 0 : index
      %c0_40 = arith.constant 0 : index
      %70 = vector.load %arg14[%c0_39, %c0_40] : memref<2x1024xf32, #tpu.memory_space<vmem>>, vector<2x1024xf32>
      tpu.vector_store %arg14[%c0_39, %c0_40], %69 {strides = array<i32>} : memref<2x1024xf32, #tpu.memory_space<vmem>>, vector<2x1024xf32>,
    } else {
    }
    %c0 = arith.constant 0 : index
    %c0_1 = arith.constant 0 : index
    %c0_2 = arith.constant 0 : index
    %3 = vector.load %arg2[%c0, %c0_1, %c0_2] : memref<2x64x3xf32, #tpu.memory_space<vmem>>, vector<2x64x3xf32>
    %4 = vector.shape_cast %3 : vector<2x64x3xf32> to vector<128x3xf32>
    %c0_3 = arith.constant 0 : index
    %c0_4 = arith.constant 0 : index
    %5 = vector.load %arg3[%c0_3, %c0_4] : memref<3x64xbf16, #tpu.memory_space<vmem>>, vector<3x64xbf16>
    %6 = arith.extf %5 : vector<3x64xbf16> to vector<3x64xf32>
    %7 = vector.extract_strided_slice %4 {offsets = [0, 0], sizes = [128, 1], strides = [1, 1]} : vector<128x3xf32> to vector<128x1xf32>
    %8 = vector.extract_strided_slice %6 {offsets = [0, 0], sizes = [1, 64], strides = [1, 1]} : vector<3x64xf32> to vector<1x64xf32>
    %9 = vector.broadcast %7 : vector<128x1xf32> to vector<128x64xf32>
    %10 = vector.broadcast %8 : vector<1x64xf32> to vector<128x64xf32>
    %11 = arith.mulf %9, %10 : vector<128x64xf32>
    %12 = vector.extract_strided_slice %4 {offsets = [0, 1], sizes = [128, 1], strides = [1, 1]} : vector<128x3xf32> to vector<128x1xf32>
    %13 = vector.extract_strided_slice %6 {offsets = [1, 0], sizes = [1, 64], strides = [1, 1]} : vector<3x64xf32> to vector<1x64xf32>
    %14 = vector.broadcast %12 : vector<128x1xf32> to vector<128x64xf32>
    %15 = vector.broadcast %13 : vector<1x64xf32> to vector<128x64xf32>
    %16 = arith.mulf %14, %15 : vector<128x64xf32>
    %17 = arith.addf %11, %16 : vector<128x64xf32>
    %18 = vector.extract_strided_slice %4 {offsets = [0, 2], sizes = [128, 1], strides = [1, 1]} : vector<128x3xf32> to vector<128x1xf32>
    %19 = vector.extract_strided_slice %6 {offsets = [2, 0], sizes = [1, 64], strides = [1, 1]} : vector<3x64xf32> to vector<1x64xf32>
    %20 = vector.broadcast %18 : vector<128x1xf32> to vector<128x64xf32>
    %21 = vector.broadcast %19 : vector<1x64xf32> to vector<128x64xf32>
    %22 = arith.mulf %20, %21 : vector<128x64xf32>
    %23 = arith.addf %17, %22 : vector<128x64xf32>
    %c0_5 = arith.constant 0 : index
    %c0_6 = arith.constant 0 : index
    %24 = vector.load %arg4[%c0_5, %c0_6] : memref<1x64xf32, #tpu.memory_space<vmem>>, vector<1x64xf32>
    %25 = vector.broadcast %24 : vector<1x64xf32> to vector<128x64xf32>
    %26 = arith.addf %23, %25 : vector<128x64xf32>
    %cst = arith.constant 0.000000e+00 : f32
    %27 = vector.broadcast %cst : f32 to vector<128x64xf32>
    %28 = arith.maximumf %26, %27 : vector<128x64xf32>
    %29 = arith.truncf %28 : vector<128x64xf32> to vector<128x64xbf16>
    %c0_7 = arith.constant 0 : index
    %c0_8 = arith.constant 0 : index
    %30 = vector.load %arg5[%c0_7, %c0_8] : memref<64x64xbf16, #tpu.memory_space<vmem>>, vector<64x64xbf16>
    %cst_9 = arith.constant dense<0.000000e+00> : vector<128x64xf32>
    %31 = tpu.matmul %29, %30, %cst_9 {dimension_numbers = #tpu.dot_dimension_numbers<[1], [0], [0], [1], [0, 0, 1, 1], [], []>} : vector<128x64xbf16>, vector<64x64xbf16>, vector<128x64xf32> -> vector<128x64xf32>
    %c0_10 = arith.constant 0 : index
    %c0_11 = arith.constant 0 : index
    %32 = vector.load %arg6[%c0_10, %c0_11] : memref<1x64xf32, #tpu.memory_space<vmem>>, vector<1x64xf32>
    %33 = vector.broadcast %32 : vector<1x64xf32> to vector<128x64xf32>
    %34 = arith.addf %31, %33 : vector<128x64xf32>
    %cst_12 = arith.constant 0.000000e+00 : f32
    %35 = vector.broadcast %cst_12 : f32 to vector<128x64xf32>
    %36 = arith.maximumf %34, %35 : vector<128x64xf32>
    %37 = arith.truncf %36 : vector<128x64xf32> to vector<128x64xbf16>
    %c0_13 = arith.constant 0 : index
    %c0_14 = arith.constant 0 : index
    %38 = vector.load %arg7[%c0_13, %c0_14] : memref<64x64xbf16, #tpu.memory_space<vmem>>, vector<64x64xbf16>
    %cst_15 = arith.constant dense<0.000000e+00> : vector<128x64xf32>
    %39 = tpu.matmul %37, %38, %cst_15 {dimension_numbers = #tpu.dot_dimension_numbers<[1], [0], [0], [1], [0, 0, 1, 1], [], []>} : vector<128x64xbf16>, vector<64x64xbf16>, vector<128x64xf32> -> vector<128x64xf32>
    %c0_16 = arith.constant 0 : index
    %c0_17 = arith.constant 0 : index
    %40 = vector.load %arg8[%c0_16, %c0_17] : memref<1x64xf32, #tpu.memory_space<vmem>>, vector<1x64xf32>
    %41 = vector.broadcast %40 : vector<1x64xf32> to vector<128x64xf32>
    %42 = arith.addf %39, %41 : vector<128x64xf32>
    %cst_18 = arith.constant 0.000000e+00 : f32
    %43 = vector.broadcast %cst_18 : f32 to vector<128x64xf32>
    %44 = arith.maximumf %42, %43 : vector<128x64xf32>
    %45 = arith.truncf %44 : vector<128x64xf32> to vector<128x64xbf16>
    %c0_19 = arith.constant 0 : index
    %c0_20 = arith.constant 0 : index
    %46 = vector.load %arg9[%c0_19, %c0_20] : memref<64x128xbf16, #tpu.memory_space<vmem>>, vector<64x128xbf16>
    %cst_21 = arith.constant dense<0.000000e+00> : vector<128x128xf32>
    %47 = tpu.matmul %45, %46, %cst_21 {dimension_numbers = #tpu.dot_dimension_numbers<[1], [0], [0], [1], [0, 0, 1, 1], [], []>} : vector<128x64xbf16>, vector<64x128xbf16>, vector<128x128xf32> -> vector<128x128xf32>
    %c0_22 = arith.constant 0 : index
    %c0_23 = arith.constant 0 : index
    %48 = vector.load %arg10[%c0_22, %c0_23] : memref<1x128xf32, #tpu.memory_space<vmem>>, vector<1x128xf32>
    %49 = vector.broadcast %48 : vector<1x128xf32> to vector<128x128xf32>
    %50 = arith.addf %47, %49 : vector<128x128xf32>
    %cst_24 = arith.constant 0.000000e+00 : f32
    %51 = vector.broadcast %cst_24 : f32 to vector<128x128xf32>
    %52 = arith.maximumf %50, %51 : vector<128x128xf32>
    %53 = arith.truncf %52 : vector<128x128xf32> to vector<128x128xbf16>
    %c0_25 = arith.constant 0 : index
    %c0_26 = arith.constant 0 : index
    %54 = vector.load %arg11[%c0_25, %c0_26] : memref<128x1024xbf16, #tpu.memory_space<vmem>>, vector<128x1024xbf16>
    %cst_27 = arith.constant dense<0.000000e+00> : vector<128x1024xf32>
    %55 = tpu.matmul %53, %54, %cst_27 {dimension_numbers = #tpu.dot_dimension_numbers<[1], [0], [0], [1], [0, 0, 1, 1], [], []>} : vector<128x128xbf16>, vector<128x1024xbf16>, vector<128x1024xf32> -> vector<128x1024xf32>
    %c0_28 = arith.constant 0 : index
    %c0_29 = arith.constant 0 : index
    %56 = vector.load %arg12[%c0_28, %c0_29] : memref<1x1024xf32, #tpu.memory_space<vmem>>, vector<1x1024xf32>
    %57 = vector.broadcast %56 : vector<1x1024xf32> to vector<128x1024xf32>
    %58 = arith.addf %55, %57 : vector<128x1024xf32>
    %cst_30 = arith.constant 0.000000e+00 : f32
    %59 = vector.broadcast %cst_30 : f32 to vector<128x1024xf32>
    %60 = arith.maximumf %58, %59 : vector<128x1024xf32>
    %c0_31 = arith.constant 0 : index
    %c0_32 = arith.constant 0 : index
    %61 = vector.load %arg14[%c0_31, %c0_32] : memref<2x1024xf32, #tpu.memory_space<vmem>>, vector<2x1024xf32>
    %62 = vector.shape_cast %60 : vector<128x1024xf32> to vector<2x64x1024xf32>
    %cst_33 = arith.constant dense<0xFF800000> : vector<2x1024xf32>
    %63 = vector.multi_reduction <maximumf>, %62, %cst_33 [1] : vector<2x64x1024xf32> to vector<2x1024xf32>
    %64 = arith.maximumf %61, %63 : vector<2x1024xf32>
    %c0_34 = arith.constant 0 : index
    %c0_35 = arith.constant 0 : index
    %65 = vector.load %arg14[%c0_34, %c0_35] : memref<2x1024xf32, #tpu.memory_space<vmem>>, vector<2x1024xf32>
    tpu.vector_store %arg14[%c0_34, %c0_35], %64 {strides = array<i32>} : memref<2x1024xf32, #tpu.memory_space<vmem>>, vector<2x1024xf32>,
    %c0_i32_36 = arith.constant 0 : i32
    %66 = arith.cmpi eq, %arg1, %c0_i32_36 : i32
    %67 = arith.extui %66 : i1 to i32
    %c0_i32_37 = arith.constant 0 : i32
    %68 = arith.cmpi ne, %67, %c0_i32_37 : i32
    scf.if %68 {
      %c0_38 = arith.constant 0 : index
      %c0_39 = arith.constant 0 : index
      %69 = vector.load %arg14[%c0_38, %c0_39] : memref<2x1024xf32, #tpu.memory_space<vmem>>, vector<2x1024xf32>
      %70 = arith.truncf %69 : vector<2x1024xf32> to vector<2x1024xbf16>
      %c0_40 = arith.constant 0 : index
      %c0_41 = arith.constant 0 : index
      %c0_42 = arith.constant 0 : index
      %71 = vector.load %arg13[%c0_40, %c0_41, %c0_42] : memref<1x2x1024xbf16, #tpu.memory_space<vmem>>, vector<1x2x1024xbf16>
      %72 = vector.shape_cast %71 : vector<1x2x1024xbf16> to vector<2x1024xbf16>
      %73 = vector.shape_cast %70 : vector<2x1024xbf16> to vector<1x2x1024xbf16>
      tpu.vector_store %arg13[%c0_40, %c0_41, %c0_42], %73 {strides = array<i32>} : memref<1x2x1024xbf16, #tpu.memory_space<vmem>>, vector<1x2x1024xbf16>,
    } else {
    }
    return
  }
  func.func @transform_0(%arg0: i32, %arg1: i32) -> (i32, i32, i32) {
    %c1_i32 = arith.constant 1 : i32
    %0 = arith.muli %arg0, %c1_i32 : i32
    %1 = arith.addi %0, %arg1 : i32
    %c0_i32 = arith.constant 0 : i32
    %c0_i32_0 = arith.constant 0 : i32
    %c0_i32_1 = arith.constant 0 : i32
    return %c0_i32, %1, %c0_i32_0 : i32, i32, i32
  }
  func.func @transform_1(%arg0: i32, %arg1: i32) -> (i32, i32) {
    %c0_i32 = arith.constant 0 : i32
    %c0_i32_0 = arith.constant 0 : i32
    %c0_i32_1 = arith.constant 0 : i32
    return %c0_i32, %c0_i32_0 : i32, i32
  }
  func.func @transform_2(%arg0: i32, %arg1: i32) -> (i32, i32) {
    %c0_i32 = arith.constant 0 : i32
    %c0_i32_0 = arith.constant 0 : i32
    %c0_i32_1 = arith.constant 0 : i32
    return %c0_i32, %c0_i32_0 : i32, i32
  }
  func.func @transform_3(%arg0: i32, %arg1: i32) -> (i32, i32) {
    %c0_i32 = arith.constant 0 : i32
    %c0_i32_0 = arith.constant 0 : i32
    %c0_i32_1 = arith.constant 0 : i32
    return %c0_i32, %c0_i32_0 : i32, i32
  }
  func.func @transform_4(%arg0: i32, %arg1: i32) -> (i32, i32) {
    %c0_i32 = arith.constant 0 : i32
    %c0_i32_0 = arith.constant 0 : i32
    %c0_i32_1 = arith.constant 0 : i32
    return %c0_i32, %c0_i32_0 : i32, i32
  }
  func.func @transform_5(%arg0: i32, %arg1: i32) -> (i32, i32) {
    %c0_i32 = arith.constant 0 : i32
    %c0_i32_0 = arith.constant 0 : i32
    %c0_i32_1 = arith.constant 0 : i32
    return %c0_i32, %c0_i32_0 : i32, i32
  }
  func.func @transform_6(%arg0: i32, %arg1: i32) -> (i32, i32) {
    %c0_i32 = arith.constant 0 : i32
    %c0_i32_0 = arith.constant 0 : i32
    %c0_i32_1 = arith.constant 0 : i32
    return %c0_i32, %c0_i32_0 : i32, i32
  }
  func.func @transform_7(%arg0: i32, %arg1: i32) -> (i32, i32) {
    %c0_i32 = arith.constant 0 : i32
    %c0_i32_0 = arith.constant 0 : i32
    %c0_i32_1 = arith.constant 0 : i32
    return %c0_i32, %c0_i32_0 : i32, i32
  }
  func.func @transform_8(%arg0: i32, %arg1: i32) -> (i32, i32) {
    %c0_i32 = arith.constant 0 : i32
    %c0_i32_0 = arith.constant 0 : i32
    %c0_i32_1 = arith.constant 0 : i32
    return %c0_i32, %c0_i32_0 : i32, i32
  }
  func.func @transform_9(%arg0: i32, %arg1: i32) -> (i32, i32) {
    %c0_i32 = arith.constant 0 : i32
    %c0_i32_0 = arith.constant 0 : i32
    %c0_i32_1 = arith.constant 0 : i32
    return %c0_i32, %c0_i32_0 : i32, i32
  }
  func.func @transform_10(%arg0: i32, %arg1: i32) -> (i32, i32) {
    %c0_i32 = arith.constant 0 : i32
    %c0_i32_0 = arith.constant 0 : i32
    %c0_i32_1 = arith.constant 0 : i32
    return %c0_i32, %c0_i32_0 : i32, i32
  }
  func.func @transform_11(%arg0: i32, %arg1: i32) -> (i32, i32, i32) {
    %c0_i32 = arith.constant 0 : i32
    %c0_i32_0 = arith.constant 0 : i32
    %c0_i32_1 = arith.constant 0 : i32
    return %arg0, %c0_i32, %c0_i32_0 : i32, i32, i32
  }
}

</mosaic_0001>

<bundles_post_ra>
// kernel: tpu_custom_call.1
= control target key start
LH: loop header
LB: loop body
LE: loop exit
PB: predicated region body
PF: predicated region fallthrough
CT: control target
= control target key end

     0   :  { %16 = vsyncpa [#allocation4], 0  ;;  %s3272_s0 = inlined_call_operand.vmem [shape: f32[2,64,3], index: 0, kind: input, shape index: {}]   ;;  %s3273_s1 = inlined_call_operand.vmem [shape: bf16[3,64], index: 1, kind: input, shape index: {}]   ;;  %s3274_s2 = inlined_call_operand.vmem [shape: f32[1,64], index: 2, kind: input, shape index: {}]   ;;  %s3275_s3 = inlined_call_operand.vmem [shape: bf16[64,64], index: 3, kind: input, shape index: {}]   ;;  %s3276_s4 = inlined_call_operand.vmem [shape: f32[1,64], index: 4, kind: input, shape index: {}]   ;;  %s3277_s5 = inlined_call_operand.vmem [shape: bf16[64,64], index: 5, kind: input, shape index: {}]   ;;  %s3278_s6 = inlined_call_operand.vmem [shape: f32[1,64], index: 6, kind: input, shape index: {}]   ;;  %s3279_s7 = inlined_call_operand.vmem [shape: bf16[64,128], index: 7, kind: input, shape index: {}]   ;;  %s3280_s8 = inlined_call_operand.vmem [shape: f32[1,128], index: 8, kind: input, shape index: {}]   ;;  %s3281_s9 = inlined_call_operand.hbm [shape: bf16[128,1024], index: 9, kind: input, shape index: {}]   ;;  %s3282_s10 = inlined_call_operand.vmem [shape: f32[1,1024], index: 10, kind: input, shape index: {}]   ;;  %s3283_s11 = inlined_call_operand.hbm [shape: bf16[1,2,1024], index: 11, kind: output, shape index: {}]  }
   0x1   :  { %17 = vsyncpa [#allocation5], 0  ;;  %s48_s19 = sshll.u32 %s3281_s9, 4  ;;  %s2639_s20 = smov [#allocation3]   ;;  %s49_s19 = int_to_ptr.hbm [resolvable:$true] %s48_s19 }
   0x2   :  { %s50_s21 = sshll.u32 %s2639_s20, 4  ;;  %s2640_s22 = smov 512   ;;  %s51_s21 = int_to_ptr.vmem [resolvable:$true] %s50_s21 }
   0x3   :  { %s2641_s23 = smov 32  }
   0x4   :  { %56 = dma.hbm_to_vmem [thread:$0]  %s49_s19, 8192, %s51_s21, [#allocation4], %s2640_s22, %s2640_s22, %s2641_s23  }
   0x5   :  { %2635 = dma.done.wait [#allocation4], 8192  }
   0x6   :  { %2636 = vsyncadd [#allocation4], 4294959104  ;;  %v2642_v0 = vmov 1   ;;  %v2643_v1 = vmov 0   ;;  %v2644_v2 = vmov 2   ;;  %v84_v3 = vld [vmem:[%s3272_s0] sm:$0xff] }
   0x7   :  { %2545 = vset.pattern.permute.xlu1 %v2642_v0  ;;  %2544 = vset.pattern.permute.xlu0 %v2643_v1  ;;  %v85_v4 = vld [vmem:[%s3272_s0 + $0x8] sm:$0xff]  ;;  %v86_v5 = vld [vmem:[%s3272_s0 + $0x10] sm:$0xff]  ;;  %v87_v6 = vld [vmem:[%s3272_s0 + $0x18] sm:$0xff]  ;;  %vm473_vm0 = vcmask 523264   ;;  %vm1997_vm1 = vcmask 1041408   ;;  %vm1999_vm2 = vcmask 1045508  }
   0x8   :  { %2546 = vset.pattern.permute.xlu2 %v2644_v2  ;;  %200 = vperm.xlu1 %2545, %v84_v3   ;;  %v88_v7 = vld [vmem:[%s3272_s0 + $0x20] sm:$0xff]  ;;  %v89_v8 = vld [vmem:[%s3272_s0 + $0x28] sm:$0xff]  ;;  %v90_v9 = vld [vmem:[%s3272_s0 + $0x30] sm:$0xff]  ;;  %vm2001_vm3 = vcmask 1043456   ;;  %vm2018_vm4 = vcmask 1041409   ;;  %vm2020_vm5 = vcmask 1043459  }
   0x9   :  { %104 = vperm.xlu0 %2544, %v84_v3   ;;  %297 = vperm.xlu2 %2546, %v84_v3   ;;  %v91_v10 = vld [vmem:[%s3272_s0 + $0x38] sm:$0xff]  ;;  %v93_v11 = vld [vmem:[%s3272_s0 + $0x48] sm:$0xff]  ;;  %v94_v12 = vld [vmem:[%s3272_s0 + $0x50] sm:$0xff]  ;;  %vm2022_vm6 = vcmask 1045509   ;;  %vm2024_vm7 = vcmask 1047559   ;;  %vm2012_vm8 = vcmask 1042434  }
   0xa   :  { %v92_v13 = vld [vmem:[%s3272_s0 + $0x40] sm:$0xff]  ;;  %v95_v14 = vld [vmem:[%s3272_s0 + $0x58] sm:$0xff]  ;;  %v2451_v17 = vld [vmem:[%s3275_s3 + $0x10] sm:$0xff]  ;;  %vm2080_vm9 = vcmask 1040384   ;;  %vm2013_vm10 = vcmask 1044484   ;;  %vm2015_vm11 = vcmask 1046534  }
   0xb   :  { %v96_v15 = vld [vmem:[%s3272_s0 + $0x60] sm:$0xff]  ;;  %v2452_v16 = vld [vmem:[%s3275_s3 + $0x18] sm:$0xff]  ;;  %v97_v18 = vld [vmem:[%s3272_s0 + $0x68] sm:$0xff] }
   0xc   :  { %502 = vmatpush.bf16.msra.mxu0 %v2452_v16  ;;  %2525 = vmatpush.bf16.msra.mxu3 %v2452_v16  ;;  %v2450_v19 = vld [vmem:[%s3275_s3 + $0x8] sm:$0xff]  ;;  %v2449_v21 = vld [vmem:[%s3275_s3] sm:$0xff]  ;;  %v2794_v22 = vld [vmem:[%s3272_s0 + $0x70] sm:$0xff] }
   0xd   :  { %v100_v23 = vld [vmem:[%s3273_s1] sm:$0x3]  ;;  %v99_v53 = vld [vmem:[%s3272_s0 + $0x78] sm:$0xff] }
   0xe   :  { %v101_v25 = vunpack.c.l.bf16 %v100_v23  ;;  %v2818_v41 = vld [vmem:[%s3274_s2] ss:$0 sm:$0xff]  ;;  %s2105_s2 = sshll.u32 %s3283_s11, 4  ;;  %s2106_s2 = int_to_ptr.hbm [resolvable:$true] %s2105_s2 }
  0x10   :  { %204 = vperm.xlu1 %2545, %v85_v4   ;;  %503 = vmatpush.bf16.msra.mxu0 %v2451_v17  ;;  %v2802_v26 = vperm.slane %v101_v25, 1  ;;  %v2804_v27 = vperm.slane %v101_v25, 0  ;;  %v2806_v30 = vperm.slane %v101_v25, 2 }
  0x11   :  { %109 = vperm.xlu0 %2544, %v85_v4   ;;  %301 = vperm.xlu2 %2546, %v85_v4  }
  0x12   :  { %2526 = vmatpush.bf16.msra.mxu3 %v2451_v17 }
  0x14   :  { %504 = vmatpush.bf16.msra.mxu0 %v2450_v19 }
  0x16   :  { %2527 = vmatpush.bf16.msra.mxu3 %v2450_v19 }
  0x18   :  { %2547 = vset.pattern.permute.xlu1 %v2643_v1  ;;  %505 = vmatpush.bf16.msra.mxu0 %v2449_v21 }
  0x19   :  { %114 = vperm.xlu0 %2544, %v86_v5   ;;  %119 = vperm.xlu1 %2547, %v87_v6  }
  0x1a   :  { %2548 = vset.pattern.permute.xlu2 %v2642_v0  ;;  %2528 = vmatpush.bf16.msra.mxu3 %v2449_v21 }
  0x1b   :  { %208 = vperm.xlu2 %2548, %v86_v5  }
  0x21   :  { %2549 = vset.pattern.permute.xlu0 %v2642_v0  ;;  %2550 = vset.pattern.permute.xlu1 %v2644_v2 }
  0x22   :  { %212 = vperm.xlu0 %2549, %v87_v6   ;;  %305 = vperm.xlu1 %2550, %v86_v5  }
  0x23   :  { %2551 = vset.pattern.permute.xlu2 %v2644_v2 }
  0x24   :  { %309 = vperm.xlu2 %2551, %v87_v6  }
  0x2a   :  { %216 = vperm.xlu0 %2549, %v88_v7   ;;  %2552 = vset.pattern.permute.xlu1 %v2643_v1 }
  0x2b   :  { %124 = vperm.xlu1 %2552, %v88_v7  }
  0x2c   :  { %2553 = vset.pattern.permute.xlu2 %v2643_v1 }
  0x2d   :  { %129 = vperm.xlu2 %2553, %v89_v8  }
  0x32   :  { %2556 = vset.pattern.permute.xlu0 %v2644_v2 }
  0x33   :  { %317 = vperm.xlu0 %2556, %v89_v8   ;;  %2554 = vset.pattern.permute.xlu1 %v2642_v0 }
  0x34   :  { %220 = vperm.xlu1 %2554, %v89_v8  }
  0x35   :  { %2555 = vset.pattern.permute.xlu2 %v2644_v2 }
  0x36   :  { %313 = vperm.xlu2 %2555, %v88_v7  }
  0x3b   :  { %321 = vperm.xlu0 %2556, %v90_v9  }
  0x3c   :  { %2557 = vset.pattern.permute.xlu1 %v2643_v1 }
  0x3d   :  { %134 = vperm.xlu1 %2557, %v90_v9  }
  0x3e   :  { %2558 = vset.pattern.permute.xlu2 %v2643_v1 }
  0x3f   :  { %139 = vperm.xlu2 %2558, %v91_v10  }
  0x43   :  { %2563 = vset.pattern.permute.xlu0 %v2643_v1 }
  0x44   :  { %149 = vperm.xlu0 %2563, %v93_v11  }
  0x45   :  { %2559 = vset.pattern.permute.xlu1 %v2642_v0 }
  0x46   :  { %224 = vperm.xlu1 %2559, %v90_v9  }
  0x47   :  { %2560 = vset.pattern.permute.xlu2 %v2642_v0 }
  0x48   :  { %228 = vperm.xlu2 %2560, %v91_v10  }
  0x4c   :  { %154 = vperm.xlu0 %2563, %v94_v12  }
  0x4e   :  { %2561 = vset.pattern.permute.xlu1 %v2644_v2 }
  0x4f   :  { %325 = vperm.xlu1 %2561, %v91_v10  }
  0x50   :  { %2562 = vset.pattern.permute.xlu2 %v2643_v1 }
  0x51   :  { %144 = vperm.xlu2 %2562, %v92_v13  }
  0x54   :  { %2570 = vset.pattern.permute.xlu0 %v2642_v0 }
  0x55   :  { %244 = vperm.xlu0 %2570, %v95_v14  }
  0x57   :  { %2564 = vset.pattern.permute.xlu1 %v2642_v0 }
  0x58   :  { %232 = vperm.xlu1 %2564, %v92_v13  }
  0x59   :  { %2565 = vset.pattern.permute.xlu2 %v2642_v0 }
  0x5a   :  { %236 = vperm.xlu2 %2565, %v93_v11  }
  0x5d   :  { %248 = vperm.xlu0 %2570, %v96_v15  }
  0x60   :  { %2566 = vset.pattern.permute.xlu1 %v2644_v2 }
  0x61   :  { %329 = vperm.xlu1 %2566, %v92_v13  }
  0x62   :  { %2567 = vset.pattern.permute.xlu2 %v2644_v2 }
  0x63   :  { %333 = vperm.xlu2 %2567, %v93_v11   ;;  %v298_v20 = vpop.permute.xlu2 %297 }
  0x64   :  { %v361_v34 = vmul.f32 %v2806_v30, %v298_v20 }
  0x65   :  { %2577 = vset.pattern.permute.xlu0 %v2644_v2 }
  0x66   :  { %349 = vperm.xlu0 %2577, %v97_v18  }
  0x69   :  { %2568 = vset.pattern.permute.xlu1 %v2643_v1 }
  0x6a   :  { %159 = vperm.xlu1 %2568, %v95_v14  }
  0x6b   :  { %2569 = vset.pattern.permute.xlu2 %v2642_v0  ;;  %v302_v24 = vpop.permute.xlu2 %301 }
  0x6c   :  { %240 = vperm.xlu2 %2569, %v94_v12   ;;  %v362_v42 = vmul.f32 %v2806_v30, %v302_v24 }
  0x6e   :  { %353 = vperm.xlu0 %2577, %v2794_v22  }
  0x72   :  { %2571 = vset.pattern.permute.xlu1 %v2644_v2 }
  0x73   :  { %337 = vperm.xlu1 %2571, %v94_v12  }
  0x74   :  { %2572 = vset.pattern.permute.xlu2 %v2644_v2 }
  0x75   :  { %341 = vperm.xlu2 %2572, %v95_v14   ;;  %v209_v33 = vpop.permute.xlu2 %208 }
  0x76   :  { %v266_v54 = vmul.f32 %v2802_v26, %v209_v33 }
  0x7a   :  { %v201_v28 = vpop.permute.xlu1 %200 }
  0x7b   :  { %v105_v29 = vpop.permute.xlu0 %104  ;;  %v264_v31 = vmul.f32 %v2802_v26, %v201_v28  ;;  %2573 = vset.pattern.permute.xlu1 %v2643_v1 }
  0x7c   :  { %v183_v32 = vmul.f32 %v2804_v27, %v105_v29  ;;  %164 = vperm.xlu1 %2573, %v96_v15  }
  0x7d   :  { %2574 = vset.pattern.permute.xlu2 %v2643_v1 }
  0x7e   :  { %169 = vperm.xlu2 %2574, %v97_v18   ;;  %v280_v35 = vadd.f32 %v264_v31, %v183_v32  ;;  %v310_v44 = vpop.permute.xlu2 %309 }
  0x7f   :  { %v364_v60 = vmul.f32 %v2806_v30, %v310_v44 }
  0x80   :  { %v377_v38 = vadd.f32 %v361_v34, %v280_v35 }
  0x82   :  { %v205_v36 = vpop.permute.xlu1 %204  ;;  %v397_v46 = vadd.f32 %v2818_v41, %v377_v38 }
  0x83   :  { %v110_v37 = vpop.permute.xlu0 %109  ;;  %v265_v39 = vmul.f32 %v2802_v26, %v205_v36 }
  0x84   :  { %v184_v40 = vmul.f32 %v2804_v27, %v110_v37  ;;  %2575 = vset.pattern.permute.xlu1 %v2642_v0  ;;  %v413_v50 = vmax.f32 %v397_v46, 0.0 }
  0x85   :  { %252 = vperm.xlu1 %2575, %v97_v18  }
  0x86   :  { %v281_v43 = vadd.f32 %v265_v39, %v184_v40  ;;  %2576 = vset.pattern.permute.xlu2 %v2644_v2 }
  0x87   :  { %345 = vperm.xlu2 %2576, %v96_v15   ;;  %v130_v56 = vpop.permute.xlu2 %129 }
  0x88   :  { %v378_v45 = vadd.f32 %v362_v42, %v281_v43  ;;  %v188_v19 = vmul.f32 %v2804_v27, %v130_v56 }
  0x8a   :  { %v398_v47 = vadd.f32 %v2818_v41, %v378_v45 }
  0x8b   :  { %v115_v48 = vpop.permute.xlu0 %114  ;;  %v120_v49 = vpop.permute.xlu1 %119 }
  0x8c   :  { %v414_v51 = vmax.f32 %v398_v47, 0.0  ;;  %v185_v55 = vmul.f32 %v2804_v27, %v115_v48  ;;  %v186_v59 = vmul.f32 %v2804_v27, %v120_v49 }
  0x8d   :  { %2578 = vset.pattern.permute.xlu1 %v2643_v1 }
  0x8e   :  { %v429_v52 = vpack.c.bf16 %v414_v51, %v413_v50  ;;  %174 = vperm.xlu1 %2578, %v2794_v22   ;;  %v282_v57 = vadd.f32 %v266_v54, %v185_v55 }
  0x8f   :  { %2579 = vset.pattern.permute.xlu2 %v2643_v1 }
  0x90   :  { %2137 = vmatmul.msk.bf16.vlgmr.msra.gmra.mxu0 %vm473_vm0, %v429_v52  ;;  %179 = vperm.xlu2 %2579, %v99_v53   ;;  %v314_v6 = vpop.permute.xlu2 %313 }
  0x91   :  { %v365_v16 = vmul.f32 %v2806_v30, %v314_v6 }
  0x94   :  { %v213_v58 = vpop.permute.xlu0 %212  ;;  %v306_v62 = vpop.permute.xlu1 %305 }
  0x95   :  { %v267_v61 = vmul.f32 %v2802_v26, %v213_v58  ;;  %v363_v63 = vmul.f32 %v2806_v30, %v306_v62 }
  0x96   :  { %2580 = vset.pattern.permute.xlu1 %v2642_v0 }
  0x97   :  { %v283_v1 = vadd.f32 %v267_v61, %v186_v59  ;;  %v379_v3 = vadd.f32 %v363_v63, %v282_v57  ;;  %256 = vperm.xlu1 %2580, %v2794_v22  }
  0x98   :  { %2581 = vset.pattern.permute.xlu2 %v2642_v0 }
  0x99   :  { %v380_v4 = vadd.f32 %v364_v60, %v283_v1  ;;  %260 = vperm.xlu2 %2581, %v99_v53   ;;  %v399_v5 = vadd.f32 %v2818_v41, %v379_v3  ;;  %v140_v0 = vpop.permute.xlu2 %139 }
  0x9a   :  { %v190_v42 = vmul.f32 %v2804_v27, %v140_v0 }
  0x9b   :  { %v400_v7 = vadd.f32 %v2818_v41, %v380_v4  ;;  %v415_v8 = vmax.f32 %v399_v5, 0.0 }
  0x9c   :  { %v217_v9 = vpop.permute.xlu0 %216 }
  0x9d   :  { %v416_v10 = vmax.f32 %v400_v7, 0.0  ;;  %v125_v11 = vpop.permute.xlu1 %124  ;;  %v268_v14 = vmul.f32 %v2802_v26, %v217_v9 }
  0x9e   :  { %v187_v13 = vmul.f32 %v2804_v27, %v125_v11 }
  0x9f   :  { %v430_v12 = vpack.c.bf16 %v416_v10, %v415_v8  ;;  %2582 = vset.pattern.permute.xlu1 %v2644_v2 }
  0xa0   :  { %357 = vperm.xlu1 %2582, %v99_v53   ;;  %v284_v15 = vadd.f32 %v268_v14, %v187_v13 }
  0xa1   :  { %2138 = vmatmul.msk.bf16.gmra.mxu0 %vm473_vm0, %v430_v12 }
  0xa2   :  { %v381_v20 = vadd.f32 %v365_v16, %v284_v15  ;;  %v229_v25 = vpop.permute.xlu2 %228 }
  0xa3   :  { %v271_v43 = vmul.f32 %v2802_v26, %v229_v25 }
  0xa4   :  { %v401_v24 = vadd.f32 %v2818_v41, %v381_v20 }
  0xa5   :  { %v318_v17 = vpop.permute.xlu0 %317  ;;  %v287_v47 = vadd.f32 %v271_v43, %v190_v42  ;;  %v2454_v43 = vld [vmem:[%s3277_s5 + $0x8] sm:$0xff] }
  0xa6   :  { %v221_v18 = vpop.permute.xlu1 %220  ;;  %v366_v22 = vmul.f32 %v2806_v30, %v318_v17  ;;  %v417_v29 = vmax.f32 %v401_v24, 0.0 }
  0xa7   :  { %v269_v21 = vmul.f32 %v2802_v26, %v221_v18 }
  0xa9   :  { %v285_v23 = vadd.f32 %v269_v21, %v188_v19 }
  0xab   :  { %v382_v2 = vadd.f32 %v366_v22, %v285_v23  ;;  %v145_v34 = vpop.permute.xlu2 %144 }
  0xac   :  { %v191_v3 = vmul.f32 %v2804_v27, %v145_v34 }
  0xad   :  { %v402_v28 = vadd.f32 %v2818_v41, %v382_v2  ;;  %v322_v37 = vpop.permute.xlu0 %321 }
  0xae   :  { %v367_v40 = vmul.f32 %v2806_v30, %v322_v37 }
  0xaf   :  { %v418_v31 = vmax.f32 %v402_v28, 0.0  ;;  %v135_v32 = vpop.permute.xlu1 %134 }
  0xb0   :  { %v189_v38 = vmul.f32 %v2804_v27, %v135_v32  ;;  %v2456_v32 = vld [vmem:[%s3277_s5 + $0x18] sm:$0xff] }
  0xb1   :  { %v431_v33 = vpack.c.bf16 %v418_v31, %v417_v29  ;;  %635 = vmatpush.bf16.msrb.mxu0 %v2456_v32  ;;  %2529 = vmatpush.bf16.msra.mxu1 %v2456_v32 }
  0xb3   :  { %2139 = vmatmul.msk.bf16.vlgmr.msra.gmra.mxu3 %vm473_vm0, %v431_v33 }
  0xb4   :  { %v237_v44 = vpop.permute.xlu2 %236 }
  0xb5   :  { %v273_v55 = vmul.f32 %v2802_v26, %v237_v44 }
  0xb6   :  { %v150_v51 = vpop.permute.xlu0 %149 }
  0xb7   :  { %v192_v56 = vmul.f32 %v2804_v27, %v150_v51 }
  0xb8   :  { %v225_v35 = vpop.permute.xlu1 %224 }
  0xb9   :  { %v270_v36 = vmul.f32 %v2802_v26, %v225_v35  ;;  %v289_v60 = vadd.f32 %v273_v55, %v192_v56 }
  0xbb   :  { %v286_v39 = vadd.f32 %v270_v36, %v189_v38  ;;  %v2455_v38 = vld [vmem:[%s3277_s5 + $0x10] sm:$0xff] }
  0xbc   :  { %636 = vmatpush.bf16.msrb.mxu0 %v2455_v38  ;;  %2530 = vmatpush.bf16.msra.mxu1 %v2455_v38 }
  0xbd   :  { %v383_v45 = vadd.f32 %v367_v40, %v286_v39  ;;  %v334_v57 = vpop.permute.xlu2 %333 }
  0xbe   :  { %v370_v61 = vmul.f32 %v2806_v30, %v334_v57  ;;  %v155_v62 = vpop.permute.xlu0 %154 }
  0xbf   :  { %v403_v49 = vadd.f32 %v2818_v41, %v383_v45  ;;  %v193_v20 = vmul.f32 %v2804_v27, %v155_v62 }
  0xc0   :  { %v386_v1 = vadd.f32 %v370_v61, %v289_v60  ;;  %637 = vmatpush.bf16.msrb.mxu0 %v2454_v43  ;;  %2531 = vmatpush.bf16.msra.mxu1 %v2454_v43 }
  0xc1   :  { %v326_v46 = vpop.permute.xlu1 %325  ;;  %v419_v53 = vmax.f32 %v403_v49, 0.0 }
  0xc2   :  { %v368_v48 = vmul.f32 %v2806_v30, %v326_v46  ;;  %v406_v7 = vadd.f32 %v2818_v41, %v386_v1 }
  0xc4   :  { %v384_v50 = vadd.f32 %v368_v48, %v287_v47  ;;  %v422_v10 = vmax.f32 %v406_v7, 0.0  ;;  %v2453_v47 = vld [vmem:[%s3277_s5] sm:$0xff] }
  0xc5   :  { %638 = vmatpush.bf16.msrb.mxu0 %v2453_v47  ;;  %2532 = vmatpush.bf16.msra.mxu1 %v2453_v47 }
  0xc6   :  { %v404_v52 = vadd.f32 %v2818_v41, %v384_v50  ;;  %v241_v5 = vpop.permute.xlu2 %240 }
  0xc7   :  { %v245_v12 = vpop.permute.xlu0 %244  ;;  %v274_v21 = vmul.f32 %v2802_v26, %v241_v5 }
  0xc8   :  { %v420_v54 = vmax.f32 %v404_v52, 0.0  ;;  %v275_v0 = vmul.f32 %v2802_v26, %v245_v12 }
  0xc9   :  { %v290_v24 = vadd.f32 %v274_v21, %v193_v20 }
  0xca   :  { %v233_v58 = vpop.permute.xlu1 %232  ;;  %v432_v59 = vpack.c.bf16 %v420_v54, %v419_v53 }
  0xcb   :  { %v272_v63 = vmul.f32 %v2802_v26, %v233_v58 }
  0xcc   :  { %2140 = vmatmul.msk.bf16.gmra.mxu3 %vm473_vm0, %v432_v59 }
  0xcd   :  { %v288_v6 = vadd.f32 %v272_v63, %v191_v3 }
  0xcf   :  { %v342_v17 = vpop.permute.xlu2 %341  ;;  %v249_v35 = vpop.permute.xlu0 %248 }
  0xd0   :  { %v372_v19 = vmul.f32 %v2806_v30, %v342_v17  ;;  %v276_v40 = vmul.f32 %v2802_v26, %v249_v35 }
  0xd3   :  { %v330_v4 = vpop.permute.xlu1 %329 }
  0xd4   :  { %v369_v8 = vmul.f32 %v2806_v30, %v330_v4 }
  0xd6   :  { %v385_v9 = vadd.f32 %v369_v8, %v288_v6 }
  0xd8   :  { %v405_v11 = vadd.f32 %v2818_v41, %v385_v9  ;;  %v170_v25 = vpop.permute.xlu2 %169  ;;  %v350_v46 = vpop.permute.xlu0 %349 }
  0xd9   :  { %v196_v49 = vmul.f32 %v2804_v27, %v170_v25  ;;  %v374_v52 = vmul.f32 %v2806_v30, %v350_v46 }
  0xda   :  { %v421_v13 = vmax.f32 %v405_v11, 0.0 }
  0xdc   :  { %v160_v14 = vpop.permute.xlu1 %159  ;;  %v433_v15 = vpack.c.bf16 %v422_v10, %v421_v13  ;;  %v2910_v10 = vld [vmem:[%s3276_s4] ss:$0 sm:$0xff] }
  0xdd   :  { %v194_v16 = vmul.f32 %v2804_v27, %v160_v14 }
  0xde   :  { %2141 = vmatmul.msk.bf16.gmra.mxu3 %vm473_vm0, %v433_v15 }
  0xdf   :  { %v291_v18 = vadd.f32 %v275_v0, %v194_v16 }
  0xe0   :  { %v354_v3 = vpop.permute.xlu0 %353 }
  0xe1   :  { %v388_v22 = vadd.f32 %v372_v19, %v291_v18  ;;  %v346_v42 = vpop.permute.xlu2 %345  ;;  %v375_v8 = vmul.f32 %v2806_v30, %v354_v3 }
  0xe2   :  { %v373_v45 = vmul.f32 %v2806_v30, %v346_v42 }
  0xe3   :  { %v408_v28 = vadd.f32 %v2818_v41, %v388_v22 }
  0xe5   :  { %v338_v23 = vpop.permute.xlu1 %337  ;;  %v424_v33 = vmax.f32 %v408_v28, 0.0 }
  0xe6   :  { %v371_v2 = vmul.f32 %v2806_v30, %v338_v23 }
  0xe8   :  { %v387_v29 = vadd.f32 %v371_v2, %v290_v24 }
  0xea   :  { %v407_v31 = vadd.f32 %v2818_v41, %v387_v29  ;;  %v180_v60 = vpop.permute.xlu2 %179 }
  0xeb   :  { %v198_v7 = vmul.f32 %v2804_v27, %v180_v60 }
  0xec   :  { %v423_v34 = vmax.f32 %v407_v31, 0.0 }
  0xee   :  { %v165_v36 = vpop.permute.xlu1 %164  ;;  %v434_v37 = vpack.c.bf16 %v424_v33, %v423_v34 }
  0xef   :  { %v195_v39 = vmul.f32 %v2804_v27, %v165_v36 }
  0xf0   :  { %2142 = vmatmul.msk.bf16.gmra.mxu3 %vm473_vm0, %v434_v37 }
  0xf1   :  { %v292_v44 = vadd.f32 %v276_v40, %v195_v39 }
  0xf3   :  { %v389_v50 = vadd.f32 %v373_v45, %v292_v44  ;;  %v261_v4 = vpop.permute.xlu2 %260 }
  0xf4   :  { %v279_v9 = vmul.f32 %v2802_v26, %v261_v4 }
  0xf5   :  { %v409_v54 = vadd.f32 %v2818_v41, %v389_v50 }
  0xf6   :  { %v295_v13 = vadd.f32 %v279_v9, %v198_v7 }
  0xf7   :  { %v253_v48 = vpop.permute.xlu1 %252  ;;  %v425_v57 = vmax.f32 %v409_v54, 0.0  ;;  %v2460_v54 = vld [vmem:[%s3279_s7 + $0x18] sm:$0xff] }
  0xf8   :  { %v277_v51 = vmul.f32 %v2802_v26, %v253_v48  ;;  %768 = vmatpush.bf16.msra.mxu0 %v2460_v54  ;;  %2533 = vmatpush.bf16.msra.mxu2 %v2460_v54  ;;  %v2387_v54 = vld [vmem:[#allocation3 + $0x180] sm:$0xf] }
  0xfa   :  { %v293_v53 = vadd.f32 %v277_v51, %v196_v49 }
  0xfc   :  { %v390_v55 = vadd.f32 %v374_v52, %v293_v53 }
  0xfe   :  { %v410_v56 = vadd.f32 %v2818_v41, %v390_v55 }
 0x100   :  { %v426_v58 = vmax.f32 %v410_v56, 0.0  ;;  %v175_v59 = vpop.permute.xlu1 %174  ;;  %v2459_v56 = vld [vmem:[%s3279_s7 + $0x10] sm:$0xff] }
 0x101   :  { %v197_v1 = vmul.f32 %v2804_v27, %v175_v59  ;;  %769 = vmatpush.bf16.msra.mxu0 %v2459_v56  ;;  %2534 = vmatpush.bf16.msra.mxu2 %v2459_v56  ;;  %v2513_v56 = vld [vmem:[#allocation3 + $0x19c] sm:$0xf0] }
 0x102   :  { %v435_v61 = vpack.c.bf16 %v426_v58, %v425_v57 }
 0x104   :  { %2143 = vmatmul.msk.bf16.gmra.mxu3 %vm473_vm0, %v435_v61  ;;  %v2458_v61 = vld [vmem:[%s3279_s7 + $0x8] sm:$0xff] }
 0x105   :  { %770 = vmatpush.bf16.msra.mxu0 %v2458_v61  ;;  %2535 = vmatpush.bf16.msra.mxu2 %v2458_v61 }
 0x109   :  { %v257_v62 = vpop.permute.xlu1 %256 }
 0x10a   :  { %v278_v63 = vmul.f32 %v2802_v26, %v257_v62 }
 0x10c   :  { %v294_v6 = vadd.f32 %v278_v63, %v197_v1  ;;  %v2457_v63 = vld [vmem:[%s3279_s7] sm:$0xff] }
 0x10d   :  { %v507_v5 = vpop.f32.mrf.mxu0  ;;  %771 = vmatpush.bf16.msra.mxu0 %v2457_v63  ;;  %2536 = vmatpush.bf16.msra.mxu2 %v2457_v63  ;;  %v2421_v63 = vld [vmem:[#allocation3 + $0x1e0] sm:$0xf0] }
 0x10e   :  { %v391_v11 = vadd.f32 %v375_v8, %v294_v6  ;;  %v508_v14 = vadd.f32 %v2910_v10, %v507_v5 }
 0x110   :  { %v411_v17 = vadd.f32 %v2818_v41, %v391_v11  ;;  %v547_v18 = vmax.f32 %v508_v14, 0.0  ;;  %v2952_v11 = vld [vmem:[%s3278_s6] ss:$0 sm:$0xff] }
 0x112   :  { %v358_v12 = vpop.permute.xlu1 %357  ;;  %v427_v22 = vmax.f32 %v411_v17, 0.0 }
 0x113   :  { %v376_v0 = vmul.f32 %v2806_v30, %v358_v12 }
 0x115   :  { %v509_v15 = vpop.f32.mrf.mxu0  ;;  %v392_v16 = vadd.f32 %v376_v0, %v295_v13 }
 0x116   :  { %v510_v27 = vadd.f32 %v2910_v10, %v509_v15 }
 0x117   :  { %v412_v26 = vadd.f32 %v2818_v41, %v392_v16 }
 0x118   :  { %v548_v19 = vmax.f32 %v510_v27, 0.0 }
 0x119   :  { %v428_v20 = vmax.f32 %v412_v26, 0.0 }
 0x11a   :  { %v563_v21 = vpack.c.bf16 %v548_v19, %v547_v18 }
 0x11b   :  { %v436_v23 = vpack.c.bf16 %v428_v20, %v427_v22 }
 0x11c   :  { %2161 = vmatmul.msk.bf16.vlgmr.msrb.gmra.mxu0 %vm473_vm0, %v563_v21 }
 0x11d   :  { %2144 = vmatmul.msk.bf16.gmra.mxu3 %vm473_vm0, %v436_v23 }
 0x11e   :  { %v512_v24 = vpop.f32.mrf.mxu0 }
 0x11f   :  { %v513_v30 = vadd.f32 %v2910_v10, %v512_v24 }
 0x121   :  { %v549_v28 = vmax.f32 %v513_v30, 0.0 }
 0x126   :  { %v514_v2 = vpop.f32.mrf.mxu0 }
 0x127   :  { %v515_v25 = vadd.f32 %v2910_v10, %v514_v2 }
 0x129   :  { %v550_v29 = vmax.f32 %v515_v25, 0.0 }
 0x12b   :  { %v564_v31 = vpack.c.bf16 %v550_v29, %v549_v28 }
 0x12d   :  { %2162 = vmatmul.msk.bf16.gmra.mxu0 %vm473_vm0, %v564_v31 }
 0x136   :  { %v517_v41 = vpop.f32.mrf.mxu3 }
 0x137   :  { %v518_v32 = vadd.f32 %v2910_v10, %v517_v41 }
 0x139   :  { %v551_v35 = vmax.f32 %v518_v32, 0.0 }
 0x13e   :  { %v519_v33 = vpop.f32.mrf.mxu3 }
 0x13f   :  { %v520_v34 = vadd.f32 %v2910_v10, %v519_v33 }
 0x141   :  { %v552_v36 = vmax.f32 %v520_v34, 0.0 }
 0x143   :  { %v565_v37 = vpack.c.bf16 %v552_v36, %v551_v35  ;;  %v2518_v36 = vld [vmem:[#allocation3 + $0x1cc] sm:$0xf] }
 0x145   :  { %2163 = vmatmul.msk.bf16.vlgmr.msra.gmra.mxu1 %vm473_vm0, %v565_v37  ;;  %v2429_v37 = vld [vmem:[#allocation3 + $0x1e8] sm:$0xf0] }
 0x14f   :  { %v522_v38 = vpop.f32.mrf.mxu3 }
 0x150   :  { %v523_v39 = vadd.f32 %v2910_v10, %v522_v38  ;;  %v2432_v38 = vor.u32 %v2518_v36, %v2429_v37  ;;  %v2489_v36 = vld [vmem:[#allocation3 + $0xdc] sm:$0xf0]  ;;  %v2485_v37 = vld [vmem:[#allocation3 + $0xc4] sm:$0xf] }
 0x152   :  { %v553_v43 = vmax.f32 %v523_v39, 0.0  ;;  %1386 = vmatpush.bf16.msrb.mxu2 %v2432_v38 }
 0x157   :  { %v524_v40 = vpop.f32.mrf.mxu3 }
 0x158   :  { %v525_v42 = vadd.f32 %v2910_v10, %v524_v40  ;;  %v2419_v40 = vld [vmem:[#allocation3 + $0x1c0] sm:$0xf] }
 0x15a   :  { %v554_v44 = vmax.f32 %v525_v42, 0.0  ;;  %v2521_v42 = vld [vmem:[#allocation3 + $0x1dc] sm:$0xf0] }
 0x15c   :  { %v566_v45 = vpack.c.bf16 %v554_v44, %v553_v43  ;;  %v2427_v43 = vld [vmem:[#allocation3 + $0x1c8] sm:$0xf] }
 0x15e   :  { %2164 = vmatmul.msk.bf16.gmra.mxu1 %vm473_vm0, %v566_v45  ;;  %v2420_v45 = vor.u32 %v2521_v42, %v2419_v40  ;;  %v2299_v42 = vld [vmem:[#allocation3 + $0xc8] sm:$0xf] }
 0x160   :  { %1239 = vmatpush.bf16.msrb.mxu3 %v2420_v45  ;;  %v2259_v45 = vld [vmem:[#allocation3 + $0x80] sm:$0xf] }
 0x161   :  { %v527_v46 = vpop.f32.mrf.mxu3 }
 0x162   :  { %v528_v47 = vadd.f32 %v2910_v10, %v527_v46  ;;  %v2522_v46 = vld [vmem:[#allocation3 + $0x1e4] sm:$0xf0] }
 0x164   :  { %v555_v50 = vmax.f32 %v528_v47, 0.0 }
 0x169   :  { %v529_v48 = vpop.f32.mrf.mxu3 }
 0x16a   :  { %v530_v49 = vadd.f32 %v2910_v10, %v529_v48  ;;  %v2428_v48 = vor.u32 %v2522_v46, %v2427_v43  ;;  %v2490_v43 = vld [vmem:[#allocation3 + $0xe4] sm:$0xf0]  ;;  %v2481_v46 = vld [vmem:[#allocation3 + $0x9c] sm:$0xf0] }
 0x16c   :  { %v556_v51 = vmax.f32 %v530_v49, 0.0  ;;  %1337 = vmatpush.bf16.msrb.mxu1 %v2428_v48 }
 0x16e   :  { %v567_v52 = vpack.c.bf16 %v556_v51, %v555_v50 }
 0x170   :  { %2165 = vmatmul.msk.bf16.gmra.mxu1 %vm473_vm0, %v567_v52  ;;  %v2510_v52 = vld [vmem:[#allocation3 + $0x18c] sm:$0xf] }
 0x173   :  { %v532_v53 = vpop.f32.mrf.mxu3 }
 0x174   :  { %v533_v55 = vadd.f32 %v2910_v10, %v532_v53  ;;  %v2397_v53 = vld [vmem:[#allocation3 + $0x1a8] sm:$0xf0] }
 0x176   :  { %v557_v59 = vmax.f32 %v533_v55, 0.0  ;;  %v2400_v55 = vor.u32 %v2510_v52, %v2397_v53  ;;  %v2482_v52 = vld [vmem:[#allocation3 + $0xa4] sm:$0xf0] }
 0x178   :  { %1387 = vmatpush.bf16.msrb.mxu2 %v2400_v55 }
 0x17b   :  { %v534_v57 = vpop.f32.mrf.mxu3 }
 0x17c   :  { %v535_v58 = vadd.f32 %v2910_v10, %v534_v57  ;;  %v2388_v57 = vor.u32 %v2513_v56, %v2387_v54 }
 0x17e   :  { %v558_v60 = vmax.f32 %v535_v58, 0.0  ;;  %1240 = vmatpush.bf16.msrb.mxu3 %v2388_v57  ;;  %v2227_v57 = vld [vmem:[#allocation3 + $0x40] sm:$0xf] }
 0x180   :  { %v568_v62 = vpack.c.bf16 %v558_v60, %v557_v59  ;;  %v2395_v59 = vld [vmem:[#allocation3 + $0x188] sm:$0xf] }
 0x181   :  { %v2514_v60 = vld [vmem:[#allocation3 + $0x1a4] sm:$0xf0] }
 0x182   :  { %2166 = vmatmul.msk.bf16.gmra.mxu1 %vm473_vm0, %v568_v62  ;;  %v2396_v61 = vor.u32 %v2514_v60, %v2395_v59  ;;  %v2517_v62 = vld [vmem:[#allocation3 + $0x1c4] sm:$0xf] }
 0x183   :  { %v2469_v59 = vld [vmem:[#allocation3 + $0x44] sm:$0xf] }
 0x184   :  { %1338 = vmatpush.bf16.msrb.mxu1 %v2396_v61 }
 0x187   :  { %v537_v1 = vpop.f32.mrf.mxu3 }
 0x188   :  { %v538_v3 = vadd.f32 %v2910_v10, %v537_v1  ;;  %v2424_v1 = vor.u32 %v2517_v62, %v2421_v63  ;;  %v2229_v63 = vld [vmem:[#allocation3 + $0x60] sm:$0xf0] }
 0x18a   :  { %v559_v6 = vmax.f32 %v538_v3, 0.0  ;;  %1288 = vmatpush.bf16.msrb.mxu0 %v2424_v1  ;;  %v2235_v1 = vld [vmem:[#allocation3 + $0x48] sm:$0xf] }
 0x18f   :  { %v539_v4 = vpop.f32.mrf.mxu3 }
 0x190   :  { %v540_v5 = vadd.f32 %v2910_v10, %v539_v4 }
 0x192   :  { %v560_v7 = vmax.f32 %v540_v5, 0.0  ;;  %v2509_v5 = vld [vmem:[#allocation3 + $0x184] sm:$0xf] }
 0x194   :  { %v569_v8 = vpack.c.bf16 %v560_v7, %v559_v6  ;;  %v2389_v6 = vld [vmem:[#allocation3 + $0x1a0] sm:$0xf0] }
 0x196   :  { %2167 = vmatmul.msk.bf16.gmra.mxu1 %vm473_vm0, %v569_v8  ;;  %v2502_v8 = vld [vmem:[#allocation3 + $0x14c] sm:$0xf] }
 0x199   :  { %v640_v9 = vpop.f32.mrf.mxu0 }
 0x19a   :  { %v641_v12 = vadd.f32 %v2952_v11, %v640_v9  ;;  %v2365_v9 = vld [vmem:[#allocation3 + $0x168] sm:$0xf0] }
 0x19c   :  { %v680_v15 = vmax.f32 %v641_v12, 0.0  ;;  %v2355_v12 = vld [vmem:[#allocation3 + $0x140] sm:$0xf] }
 0x1a0   :  { %v542_v13 = vpop.f32.mrf.mxu3 }
 0x1a1   :  { %v642_v14 = vpop.f32.mrf.mxu0  ;;  %v543_v17 = vadd.f32 %v2910_v10, %v542_v13  ;;  %v2392_v13 = vor.u32 %v2509_v5, %v2389_v6 }
 0x1a2   :  { %v643_v0 = vadd.f32 %v2952_v11, %v642_v14  ;;  %v2368_v14 = vor.u32 %v2502_v8, %v2365_v9  ;;  %v2465_v8 = vld [vmem:[#allocation3 + $0x1c] sm:$0xf0]  ;;  %v2461_v9 = vld [vmem:[#allocation3 + $0x4] sm:$0xf] }
 0x1a3   :  { %v561_v20 = vmax.f32 %v543_v17, 0.0  ;;  %1289 = vmatpush.bf16.msrb.mxu0 %v2392_v13  ;;  %v2363_v17 = vld [vmem:[#allocation3 + $0x148] sm:$0xf]  ;;  %v2197_v13 = vld [vmem:[#allocation3 + $0x20] sm:$0xf0] }
 0x1a4   :  { %v681_v16 = vmax.f32 %v643_v0, 0.0  ;;  %v2505_v0 = vld [vmem:[#allocation3 + $0x15c] sm:$0xf0]  ;;  %1388 = vmatpush.bf16.msrb.mxu2 %v2368_v14  ;;  %v2203_v14 = vld [vmem:[#allocation3 + $0x8] sm:$0xf] }
 0x1a6   :  { %v696_v27 = vpack.c.bf16 %v681_v16, %v680_v15 }
 0x1a8   :  { %2185 = vmatmul.msk.bf16.vlgmr.msra.gmra.mxu0 %vm473_vm0, %v696_v27  ;;  %v544_v18 = vpop.f32.mrf.mxu3  ;;  %v2356_v27 = vor.u32 %v2505_v0, %v2355_v12  ;;  %v2466_v0 = vld [vmem:[#allocation3 + $0x24] sm:$0xf0] }
 0x1a9   :  { %v545_v26 = vadd.f32 %v2910_v10, %v544_v18  ;;  %v2506_v18 = vld [vmem:[#allocation3 + $0x164] sm:$0xf0] }
 0x1aa   :  { %v645_v19 = vpop.f32.mrf.mxu0  ;;  %1241 = vmatpush.bf16.msrb.mxu3 %v2356_v27  ;;  %v2486_v27 = vld [vmem:[#allocation3 + $0xcc] sm:$0xf] }
 0x1ab   :  { %v562_v21 = vmax.f32 %v545_v26, 0.0  ;;  %v646_v23 = vadd.f32 %v2952_v11, %v645_v19  ;;  %v2501_v26 = vld [vmem:[#allocation3 + $0x144] sm:$0xf] }
 0x1ad   :  { %v570_v22 = vpack.c.bf16 %v562_v21, %v561_v20  ;;  %v682_v2 = vmax.f32 %v646_v23, 0.0  ;;  %v2364_v20 = vor.u32 %v2506_v18, %v2363_v17  ;;  %v2357_v21 = vld [vmem:[#allocation3 + $0x160] sm:$0xf0]  ;;  %v2323_v23 = vld [vmem:[#allocation3 + $0x100] sm:$0xf] }
 0x1ae   :  { %v2301_v17 = vld [vmem:[#allocation3 + $0xe8] sm:$0xf0] }
 0x1af   :  { %2168 = vmatmul.msk.bf16.gmra.mxu1 %vm473_vm0, %v570_v22  ;;  %v2360_v22 = vor.u32 %v2501_v26, %v2357_v21  ;;  %v2304_v18 = vor.u32 %v2486_v27, %v2301_v17 }
 0x1b0   :  { %1339 = vmatpush.bf16.msrb.mxu1 %v2364_v20  ;;  %v2269_v20 = vld [vmem:[#allocation3 + $0xa8] sm:$0xf0] }
 0x1b1   :  { %1290 = vmatpush.bf16.msrb.mxu0 %v2360_v22 }
 0x1b2   :  { %v647_v24 = vpop.f32.mrf.mxu0 }
 0x1b3   :  { %v648_v30 = vadd.f32 %v2952_v11, %v647_v24  ;;  %v2497_v24 = vld [vmem:[#allocation3 + $0x11c] sm:$0xf0] }
 0x1b5   :  { %v683_v25 = vmax.f32 %v648_v30, 0.0  ;;  %v2493_v30 = vld [vmem:[#allocation3 + $0x104] sm:$0xf] }
 0x1b7   :  { %v697_v28 = vpack.c.bf16 %v683_v25, %v682_v2  ;;  %v2324_v2 = vor.u32 %v2497_v24, %v2323_v23  ;;  %v2325_v25 = vld [vmem:[#allocation3 + $0x120] sm:$0xf0] }
 0x1b9   :  { %2186 = vmatmul.msk.bf16.gmra.mxu0 %vm473_vm0, %v697_v28  ;;  %v2331_v28 = vld [vmem:[#allocation3 + $0x108] sm:$0xf]  ;;  %1242 = vmatpush.bf16.msrb.mxu3 %v2324_v2 }
 0x1c2   :  { %v650_v29 = vpop.f32.mrf.mxu1 }
 0x1c3   :  { %v651_v31 = vadd.f32 %v2952_v11, %v650_v29  ;;  %v2498_v29 = vld [vmem:[#allocation3 + $0x124] sm:$0xf0] }
 0x1c5   :  { %v684_v32 = vmax.f32 %v651_v31, 0.0 }
 0x1ca   :  { %v652_v10 = vpop.f32.mrf.mxu1 }
 0x1cb   :  { %v653_v41 = vadd.f32 %v2952_v11, %v652_v10  ;;  %v2328_v10 = vor.u32 %v2493_v30, %v2325_v25 }
 0x1cd   :  { %v685_v33 = vmax.f32 %v653_v41, 0.0  ;;  %v2332_v41 = vor.u32 %v2498_v29, %v2331_v28  ;;  %1291 = vmatpush.bf16.msrb.mxu0 %v2328_v10  ;;  %v2470_v28 = vld [vmem:[#allocation3 + $0x4c] sm:$0xf] }
 0x1ce   :  { %v2237_v29 = vld [vmem:[#allocation3 + $0x68] sm:$0xf0] }
 0x1cf   :  { %v698_v34 = vpack.c.bf16 %v685_v33, %v684_v32  ;;  %v2494_v32 = vld [vmem:[#allocation3 + $0x10c] sm:$0xf]  ;;  %1340 = vmatpush.bf16.msrb.mxu1 %v2332_v41 }
 0x1d0   :  { %v2333_v33 = vld [vmem:[#allocation3 + $0x128] sm:$0xf0] }
 0x1d1   :  { %2187 = vmatmul.msk.bf16.vlgmr.msra.gmra.mxu2 %vm473_vm0, %v698_v34  ;;  %v2336_v34 = vor.u32 %v2494_v32, %v2333_v33  ;;  %v2462_v41 = vld [vmem:[#allocation3 + $0xc] sm:$0xf] }
 0x1d2   :  { %v2205_v32 = vld [vmem:[#allocation3 + $0x28] sm:$0xf0] }
 0x1d3   :  { %1389 = vmatpush.bf16.msrb.mxu2 %v2336_v34  ;;  %v2208_v33 = vor.u32 %v2462_v41, %v2205_v32  ;;  %v2981_v34 = vld [vmem:[%s3280_s8] ss:$0 sm:$0xff] }
 0x1d4   :  { %v2508_v41 = vld [vmem:[#allocation3 + $0x174] sm:$0xf0] }
 0x1d7   :  { %1390 = vmatpush.bf16.msrb.mxu2 %v2304_v18 }
 0x1db   :  { %v655_v35 = vpop.f32.mrf.mxu1 }
 0x1dc   :  { %v656_v39 = vadd.f32 %v2952_v11, %v655_v35  ;;  %v2291_v35 = vld [vmem:[#allocation3 + $0xc0] sm:$0xf] }
 0x1dd   :  { %v2292_v38 = vor.u32 %v2489_v36, %v2291_v35 }
 0x1de   :  { %v686_v49 = vmax.f32 %v656_v39, 0.0  ;;  %v2293_v39 = vld [vmem:[#allocation3 + $0xe0] sm:$0xf0] }
 0x1df   :  { %v2296_v40 = vor.u32 %v2485_v37, %v2293_v39  ;;  %1243 = vmatpush.bf16.msrb.mxu3 %v2292_v38 }
 0x1e1   :  { %1292 = vmatpush.bf16.msrb.mxu0 %v2296_v40 }
 0x1e3   :  { %v657_v44 = vpop.f32.mrf.mxu1 }
 0x1e4   :  { %v658_v47 = vadd.f32 %v2952_v11, %v657_v44  ;;  %v2300_v44 = vor.u32 %v2490_v43, %v2299_v42 }
 0x1e6   :  { %v687_v50 = vmax.f32 %v658_v47, 0.0  ;;  %v2477_v47 = vld [vmem:[#allocation3 + $0x84] sm:$0xf]  ;;  %1341 = vmatpush.bf16.msrb.mxu1 %v2300_v44 }
 0x1e8   :  { %v699_v51 = vpack.c.bf16 %v687_v50, %v686_v49  ;;  %v2260_v49 = vor.u32 %v2481_v46, %v2259_v45  ;;  %v2261_v50 = vld [vmem:[#allocation3 + $0xa0] sm:$0xf0] }
 0x1e9   :  { %v2264_v54 = vor.u32 %v2477_v47, %v2261_v50 }
 0x1ea   :  { %2188 = vmatmul.msk.bf16.gmra.mxu2 %vm473_vm0, %v699_v51  ;;  %v2267_v51 = vld [vmem:[#allocation3 + $0x88] sm:$0xf]  ;;  %1244 = vmatpush.bf16.msrb.mxu3 %v2260_v49 }
 0x1eb   :  { %v2268_v55 = vor.u32 %v2482_v52, %v2267_v51  ;;  %1293 = vmatpush.bf16.msrb.mxu0 %v2264_v54 }
 0x1ed   :  { %v660_v58 = vpop.f32.mrf.mxu1  ;;  %1342 = vmatpush.bf16.msrb.mxu1 %v2268_v55  ;;  %v2520_v55 = vld [vmem:[#allocation3 + $0x1dc] sm:$0xf] }
 0x1ee   :  { %v661_v3 = vadd.f32 %v2952_v11, %v660_v58  ;;  %v2473_v58 = vld [vmem:[#allocation3 + $0x5c] sm:$0xf0] }
 0x1ef   :  { %v2228_v62 = vor.u32 %v2473_v58, %v2227_v57  ;;  %v2435_v57 = vld [vmem:[#allocation3 + $0x1d0] sm:$0xf] }
 0x1f0   :  { %v688_v15 = vmax.f32 %v661_v3, 0.0  ;;  %v2232_v3 = vor.u32 %v2469_v59, %v2229_v63  ;;  %v2443_v63 = vld [vmem:[#allocation3 + $0x1d8] sm:$0xf] }
 0x1f1   :  { %1245 = vmatpush.bf16.msrb.mxu3 %v2228_v62  ;;  %v2437_v62 = vld [vmem:[#allocation3 + $0x1f0] sm:$0xf0] }
 0x1f2   :  { %1294 = vmatpush.bf16.msrb.mxu0 %v2232_v3  ;;  %v2524_v3 = vld [vmem:[#allocation3 + $0x1f4] sm:$0xf0] }
 0x1f5   :  { %v662_v4 = vpop.f32.mrf.mxu1 }
 0x1f6   :  { %v663_v7 = vadd.f32 %v2952_v11, %v662_v4  ;;  %v2474_v4 = vld [vmem:[#allocation3 + $0x64] sm:$0xf0] }
 0x1f7   :  { %v2236_v6 = vor.u32 %v2474_v4, %v2235_v1  ;;  %v2444_v4 = vor.u32 %v2524_v3, %v2443_v63  ;;  %v2487_v63 = vld [vmem:[#allocation3 + $0xd4] sm:$0xf]  ;;  %v2315_v3 = vld [vmem:[#allocation3 + $0xd8] sm:$0xf] }
 0x1f8   :  { %v689_v16 = vmax.f32 %v663_v7, 0.0  ;;  %v2195_v7 = vld [vmem:[#allocation3] sm:$0xf] }
 0x1f9   :  { %1343 = vmatpush.bf16.msrb.mxu1 %v2236_v6  ;;  %v2196_v12 = vor.u32 %v2465_v8, %v2195_v7  ;;  %v2413_v6 = vld [vmem:[#allocation3 + $0x1b8] sm:$0xf0]  ;;  %v2403_v7 = vld [vmem:[#allocation3 + $0x190] sm:$0xf] }
 0x1fa   :  { %v700_v19 = vpack.c.bf16 %v689_v16, %v688_v15  ;;  %v2200_v15 = vor.u32 %v2461_v9, %v2197_v13  ;;  %v2204_v16 = vor.u32 %v2466_v0, %v2203_v14  ;;  %v2515_v9 = vld [vmem:[#allocation3 + $0x1ac] sm:$0xf0]  ;;  %v2405_v13 = vld [vmem:[#allocation3 + $0x1b0] sm:$0xf0] }
 0x1fb   :  { %1246 = vmatpush.bf16.msrb.mxu3 %v2196_v12  ;;  %v2511_v12 = vld [vmem:[#allocation3 + $0x194] sm:$0xf]  ;;  %v2404_v14 = vor.u32 %v2515_v9, %v2403_v7 }
 0x1fc   :  { %2189 = vmatmul.msk.bf16.gmra.mxu2 %vm473_vm0, %v700_v19  ;;  %1295 = vmatpush.bf16.msrb.mxu0 %v2200_v15  ;;  %v2478_v19 = vld [vmem:[#allocation3 + $0x8c] sm:$0xf]  ;;  %v2408_v0 = vor.u32 %v2511_v12, %v2405_v13  ;;  %v2411_v15 = vld [vmem:[#allocation3 + $0x198] sm:$0xf] }
 0x1fd   :  { %1344 = vmatpush.bf16.msrb.mxu1 %v2204_v16  ;;  %v2272_v21 = vor.u32 %v2478_v19, %v2269_v20  ;;  %v2516_v16 = vld [vmem:[#allocation3 + $0x1b4] sm:$0xf0]  ;;  %v2504_v20 = vld [vmem:[#allocation3 + $0x15c] sm:$0xf] }
 0x1fe   :  { %v2412_v27 = vor.u32 %v2516_v16, %v2411_v15  ;;  %v2480_v15 = vld [vmem:[#allocation3 + $0x9c] sm:$0xf] }
 0x1ff   :  { %v665_v31 = vpop.f32.mrf.mxu1  ;;  %1391 = vmatpush.bf16.msrb.mxu2 %v2272_v21  ;;  %v2381_v21 = vld [vmem:[#allocation3 + $0x178] sm:$0xf0] }
 0x200   :  { %v666_v48 = vadd.f32 %v2952_v11, %v665_v31  ;;  %v2240_v31 = vor.u32 %v2470_v28, %v2237_v29  ;;  %v2503_v28 = vld [vmem:[#allocation3 + $0x154] sm:$0xf]  ;;  %v2285_v16 = vld [vmem:[#allocation3 + $0xb8] sm:$0xf0] }
 0x201   :  { %1533 = vmatpush.bf16.msra.mxu1 %v2444_v4 }
 0x202   :  { %v690_v60 = vmax.f32 %v666_v48, 0.0 }
 0x203   :  { %1392 = vmatpush.bf16.msrb.mxu2 %v2240_v31  ;;  %v2373_v31 = vld [vmem:[#allocation3 + $0x170] sm:$0xf0] }
 0x204   :  { %v2376_v32 = vor.u32 %v2503_v28, %v2373_v31 }
 0x205   :  { %1534 = vmatpush.bf16.msra.mxu1 %v2412_v27  ;;  %v2275_v27 = vld [vmem:[#allocation3 + $0x90] sm:$0xf] }
 0x207   :  { %v667_v53 = vpop.f32.mrf.mxu1  ;;  %1393 = vmatpush.bf16.msrb.mxu2 %v2208_v33 }
 0x208   :  { %v668_v56 = vadd.f32 %v2952_v11, %v667_v53 }
 0x20a   :  { %v691_v61 = vmax.f32 %v668_v56, 0.0  ;;  %v2445_v56 = vld [vmem:[#allocation3 + $0x1f8] sm:$0xf0] }
 0x20b   :  { %v2448_v59 = vor.u32 %v2520_v55, %v2445_v56  ;;  %v2488_v56 = vld [vmem:[#allocation3 + $0xdc] sm:$0xf] }
 0x20c   :  { %v701_v5 = vpack.c.bf16 %v691_v61, %v690_v60  ;;  %v2519_v61 = vld [vmem:[#allocation3 + $0x1d4] sm:$0xf] }
 0x20d   :  { %1582 = vmatpush.bf16.msra.mxu2 %v2448_v59  ;;  %v2440_v1 = vor.u32 %v2519_v61, %v2437_v62  ;;  %v2307_v59 = vld [vmem:[#allocation3 + $0xd0] sm:$0xf] }
 0x20e   :  { %2190 = vmatmul.msk.bf16.gmra.mxu2 %vm473_vm0, %v701_v5  ;;  %v2512_v5 = vld [vmem:[#allocation3 + $0x19c] sm:$0xf]  ;;  %v2491_v61 = vld [vmem:[#allocation3 + $0xec] sm:$0xf0] }
 0x20f   :  { %1484 = vmatpush.bf16.msra.mxu0 %v2440_v1  ;;  %v2416_v8 = vor.u32 %v2512_v5, %v2413_v6  ;;  %v2308_v62 = vor.u32 %v2491_v61, %v2307_v59  ;;  %v2309_v1 = vld [vmem:[#allocation3 + $0xf0] sm:$0xf0]  ;;  %v2492_v5 = vld [vmem:[#allocation3 + $0xf4] sm:$0xf0] }
 0x210   :  { %v2312_v4 = vor.u32 %v2487_v63, %v2309_v1  ;;  %v2316_v6 = vor.u32 %v2492_v5, %v2315_v3  ;;  %v2213_v63 = vld [vmem:[#allocation3 + $0x30] sm:$0xf0]  ;;  %v2219_v1 = vld [vmem:[#allocation3 + $0x18] sm:$0xf] }
 0x211   :  { %1583 = vmatpush.bf16.msra.mxu2 %v2416_v8  ;;  %v2468_v5 = vld [vmem:[#allocation3 + $0x34] sm:$0xf0] }
 0x213   :  { %v670_v26 = vpop.f32.mrf.mxu1  ;;  %1485 = vmatpush.bf16.msra.mxu0 %v2408_v0 }
 0x214   :  { %v671_v22 = vadd.f32 %v2952_v11, %v670_v26 }
 0x216   :  { %v692_v30 = vmax.f32 %v671_v22, 0.0  ;;  %v2384_v22 = vor.u32 %v2504_v20, %v2381_v21  ;;  %v2277_v20 = vld [vmem:[#allocation3 + $0xb0] sm:$0xf0] }
 0x217   :  { %1486 = vmatpush.bf16.msra.mxu0 %v2376_v32  ;;  %v2253_v32 = vld [vmem:[#allocation3 + $0x78] sm:$0xf0] }
 0x218   :  { %1584 = vmatpush.bf16.msra.mxu2 %v2384_v22  ;;  %v2283_v22 = vld [vmem:[#allocation3 + $0x98] sm:$0xf] }
 0x21b   :  { %v672_v23 = vpop.f32.mrf.mxu1 }
 0x21c   :  { %v673_v24 = vadd.f32 %v2952_v11, %v672_v23 }
 0x21e   :  { %v693_v2 = vmax.f32 %v673_v24, 0.0 }
 0x220   :  { %v702_v25 = vpack.c.bf16 %v693_v2, %v692_v30  ;;  %v2371_v2 = vld [vmem:[#allocation3 + $0x150] sm:$0xf] }
 0x222   :  { %2191 = vmatmul.msk.bf16.gmra.mxu2 %vm473_vm0, %v702_v25  ;;  %v2507_v25 = vld [vmem:[#allocation3 + $0x16c] sm:$0xf0] }
 0x223   :  { %v2372_v29 = vor.u32 %v2507_v25, %v2371_v2 }
 0x225   :  { %v773_v10 = vpop.f32.mrf.mxu0 }
 0x226   :  { %v774_v35 = vadd.f32 %v2981_v34, %v773_v10  ;;  %v2379_v10 = vld [vmem:[#allocation3 + $0x158] sm:$0xf] }
 0x227   :  { %v2380_v33 = vor.u32 %v2508_v41, %v2379_v10  ;;  %v2472_v41 = vld [vmem:[#allocation3 + $0x5c] sm:$0xf] }
 0x228   :  { %v813_v39 = vmax.f32 %v774_v35, 0.0  ;;  %v2496_v35 = vld [vmem:[#allocation3 + $0x11c] sm:$0xf] }
 0x229   :  { %1535 = vmatpush.bf16.msra.mxu1 %v2380_v33  ;;  %v2256_v33 = vor.u32 %v2472_v41, %v2253_v32 }
 0x22c   :  { %v675_v36 = vpop.f32.mrf.mxu1 }
 0x22d   :  { %v775_v37 = vpop.f32.mrf.mxu0  ;;  %v676_v43 = vadd.f32 %v2952_v11, %v675_v36  ;;  %v2349_v36 = vld [vmem:[#allocation3 + $0x138] sm:$0xf0] }
 0x22e   :  { %v776_v38 = vadd.f32 %v2981_v34, %v775_v37 }
 0x22f   :  { %v694_v47 = vmax.f32 %v676_v43, 0.0 }
 0x230   :  { %v814_v40 = vmax.f32 %v776_v38, 0.0  ;;  %v2352_v38 = vor.u32 %v2496_v35, %v2349_v36  ;;  %v2243_v35 = vld [vmem:[#allocation3 + $0x50] sm:$0xf] }
 0x231   :  { %v2475_v36 = vld [vmem:[#allocation3 + $0x6c] sm:$0xf0] }
 0x232   :  { %v2985_v42 = vpack.c.bf16 %v814_v40, %v813_v39  ;;  %1585 = vmatpush.bf16.msra.mxu2 %v2352_v38  ;;  %v2339_v39 = vld [vmem:[#allocation3 + $0x110] sm:$0xf] }
 0x233   :  { %v2499_v40 = vld [vmem:[#allocation3 + $0x12c] sm:$0xf0] }
 0x234   :  { %1247 = vmatmul.bf16.vlgmr.msrb.gmra.mxu3 %v2985_v42  ;;  %1296 = vmatmul.bf16.vlgmr.msrb.gmra.mxu0 %v2985_v42  ;;  %v677_v44 = vpop.f32.mrf.mxu1  ;;  %v2340_v43 = vor.u32 %v2499_v40, %v2339_v39  ;;  %v2471_v39 = vld [vmem:[#allocation3 + $0x54] sm:$0xf] }
 0x235   :  { %1345 = vmatmul.bf16.vlgmr.msrb.gmra.mxu1 %v2985_v42  ;;  %v678_v45 = vadd.f32 %v2952_v11, %v677_v44  ;;  %v2523_v11 = vld [vmem:[#allocation3 + $0x1ec] sm:$0xf0]  ;;  %v2245_v40 = vld [vmem:[#allocation3 + $0x70] sm:$0xf0] }
 0x236   :  { %v778_v46 = vpop.f32.mrf.mxu0  ;;  %v2436_v60 = vor.u32 %v2523_v11, %v2435_v57  ;;  %v2317_v57 = vld [vmem:[#allocation3 + $0xf8] sm:$0xf0] }
 0x237   :  { %v695_v48 = vmax.f32 %v678_v45, 0.0  ;;  %v779_v50 = vadd.f32 %v2981_v34, %v778_v46  ;;  %v2495_v45 = vld [vmem:[#allocation3 + $0x114] sm:$0xf] }
 0x238   :  { %1435 = vmatpush.bf16.msra.mxu3 %v2436_v60  ;;  %v2341_v46 = vld [vmem:[#allocation3 + $0x130] sm:$0xf0]  ;;  %v2320_v60 = vor.u32 %v2488_v56, %v2317_v57 }
 0x239   :  { %v703_v49 = vpack.c.bf16 %v695_v48, %v694_v47  ;;  %v815_v53 = vmax.f32 %v779_v50, 0.0  ;;  %v2347_v47 = vld [vmem:[#allocation3 + $0x118] sm:$0xf] }
 0x23a   :  { %v2500_v50 = vld [vmem:[#allocation3 + $0x134] sm:$0xf0]  ;;  %1586 = vmatpush.bf16.msra.mxu2 %v2320_v60  ;;  %v2467_v60 = vld [vmem:[#allocation3 + $0x2c] sm:$0xf0] }
 0x23b   :  { %2192 = vmatmul.msk.bf16.gmra.mxu2 %vm473_vm0, %v703_v49  ;;  %v2344_v49 = vor.u32 %v2495_v45, %v2341_v46  ;;  %v2476_v45 = vld [vmem:[#allocation3 + $0x74] sm:$0xf0] }
 0x23c   :  { %1436 = vmatpush.bf16.msra.mxu3 %v2404_v14 }
 0x23d   :  { %1487 = vmatpush.bf16.msra.mxu0 %v2344_v49 }
 0x23e   :  { %v780_v51 = vpop.f32.mrf.mxu0 }
 0x23f   :  { %v781_v52 = vadd.f32 %v2981_v34, %v780_v51 }
 0x240   :  { %1437 = vmatpush.bf16.msra.mxu3 %v2372_v29 }
 0x241   :  { %v816_v54 = vmax.f32 %v781_v52, 0.0  ;;  %v2348_v52 = vor.u32 %v2500_v50, %v2347_v47  ;;  %1488 = vmatpush.bf16.msra.mxu0 %v2312_v4  ;;  %v2464_v50 = vld [vmem:[#allocation3 + $0x1c] sm:$0xf] }
 0x243   :  { %v2995_v58 = vpack.c.bf16 %v816_v54, %v815_v53  ;;  %1536 = vmatpush.bf16.msra.mxu1 %v2348_v52 }
 0x244   :  { %1438 = vmatpush.bf16.msra.mxu3 %v2340_v43  ;;  %v2251_v43 = vld [vmem:[#allocation3 + $0x58] sm:$0xf] }
 0x245   :  { %1252 = vmatmul.bf16.gmra.mxu3 %v2995_v58  ;;  %1301 = vmatmul.bf16.gmra.mxu0 %v2995_v58  ;;  %v2252_v46 = vor.u32 %v2476_v45, %v2251_v43 }
 0x246   :  { %1350 = vmatmul.bf16.gmra.mxu1 %v2995_v58 }
 0x247   :  { %1537 = vmatpush.bf16.msra.mxu1 %v2316_v6  ;;  %v3045_v6 = vld [vmem:[%s3282_s10] sm:$0xff]  ;;  %s2645_s10 = smov [#allocation6]  }
 0x248   :  { %1439 = vmatpush.bf16.msra.mxu3 %v2308_v62  ;;  %v2463_v62 = vld [vmem:[#allocation3 + $0x14] sm:$0xf]  ;;  %s2103_s23 = sshll.u32 %s2645_s10, 4  ;;  %s2104_s23 = int_to_ptr.vmem [resolvable:$true] %s2103_s23 }
 0x249   :  { %v2216_v4 = vor.u32 %v2463_v62, %v2213_v63 }
 0x24b   :  { %1394 = vmatmul.bf16.vlgmr.msrb.gmra.mxu2 %v2985_v42 }
 0x254   :  { %v783_v17 = vpop.f32.mrf.mxu2 }
 0x255   :  { %v784_v18 = vadd.f32 %v2981_v34, %v783_v17  ;;  %v2288_v17 = vor.u32 %v2480_v15, %v2285_v16 }
 0x257   :  { %v817_v23 = vmax.f32 %v784_v18, 0.0  ;;  %v2483_v18 = vld [vmem:[#allocation3 + $0xac] sm:$0xf0]  ;;  %1587 = vmatpush.bf16.msra.mxu2 %v2288_v17 }
 0x25b   :  { %1399 = vmatmul.bf16.gmra.mxu2 %v2995_v58 }
 0x25c   :  { %v785_v26 = vpop.f32.mrf.mxu2  ;;  %1588 = vmatpush.bf16.msra.mxu2 %v2256_v33 }
 0x25d   :  { %v786_v19 = vadd.f32 %v2981_v34, %v785_v26  ;;  %v2276_v26 = vor.u32 %v2483_v18, %v2275_v27 }
 0x25f   :  { %v818_v24 = vmax.f32 %v786_v19, 0.0  ;;  %v2479_v19 = vld [vmem:[#allocation3 + $0x94] sm:$0xf]  ;;  %1440 = vmatpush.bf16.msra.mxu3 %v2276_v26  ;;  %v3058_v26 = vperm.slane %v3045_v6, 0 }
 0x260   :  { %v2280_v21 = vor.u32 %v2479_v19, %v2277_v20 }
 0x261   :  { %v3004_v30 = vpack.c.bf16 %v818_v24, %v817_v23  ;;  %v2484_v23 = vld [vmem:[#allocation3 + $0xb4] sm:$0xf0] }
 0x262   :  { %v2284_v24 = vor.u32 %v2484_v23, %v2283_v22  ;;  %1489 = vmatpush.bf16.msra.mxu0 %v2280_v21 }
 0x263   :  { %1257 = vmatmul.bf16.gmra.mxu3 %v3004_v30  ;;  %1306 = vmatmul.bf16.gmra.mxu0 %v3004_v30 }
 0x264   :  { %1355 = vmatmul.bf16.gmra.mxu1 %v3004_v30 }
 0x265   :  { %1538 = vmatpush.bf16.msra.mxu1 %v2284_v24 }
 0x269   :  { %1539 = vmatpush.bf16.msra.mxu1 %v2252_v46 }
 0x26b   :  { %1404 = vmatmul.bf16.gmra.mxu2 %v3004_v30 }
 0x26d   :  { %v788_v37 = vpop.f32.mrf.mxu2 }
 0x26e   :  { %v789_v44 = vadd.f32 %v2981_v34, %v788_v37  ;;  %v2244_v37 = vor.u32 %v2475_v36, %v2243_v35 }
 0x270   :  { %v819_v53 = vmax.f32 %v789_v44, 0.0  ;;  %1441 = vmatpush.bf16.msra.mxu3 %v2244_v37  ;;  %v2248_v44 = vor.u32 %v2471_v39, %v2245_v40 }
 0x272   :  { %1490 = vmatpush.bf16.msra.mxu0 %v2248_v44 }
 0x275   :  { %v790_v48 = vpop.f32.mrf.mxu2 }
 0x276   :  { %v791_v51 = vadd.f32 %v2981_v34, %v790_v48  ;;  %1491 = vmatpush.bf16.msra.mxu0 %v2216_v4 }
 0x278   :  { %v820_v54 = vmax.f32 %v791_v51, 0.0  ;;  %v2221_v51 = vld [vmem:[#allocation3 + $0x38] sm:$0xf0] }
 0x279   :  { %v2224_v56 = vor.u32 %v2464_v50, %v2221_v51 }
 0x27a   :  { %v3012_v55 = vpack.c.bf16 %v820_v54, %v819_v53 }
 0x27b   :  { %1589 = vmatpush.bf16.msra.mxu2 %v2224_v56 }
 0x27c   :  { %1262 = vmatmul.bf16.gmra.mxu3 %v3012_v55  ;;  %1311 = vmatmul.bf16.gmra.mxu0 %v3012_v55 }
 0x27d   :  { %1360 = vmatmul.bf16.gmra.mxu1 %v3012_v55  ;;  %1409 = vmatmul.bf16.gmra.mxu2 %v3012_v55 }
 0x27f   :  { %v793_v11 = vpop.f32.mrf.mxu2 }
 0x280   :  { %v794_v7 = vadd.f32 %v2981_v34, %v793_v11  ;;  %v2211_v11 = vld [vmem:[#allocation3 + $0x10] sm:$0xf] }
 0x281   :  { %v2212_v61 = vor.u32 %v2467_v60, %v2211_v11 }
 0x282   :  { %v821_v12 = vmax.f32 %v794_v7, 0.0  ;;  %v2220_v7 = vor.u32 %v2468_v5, %v2219_v1 }
 0x283   :  { %1442 = vmatpush.bf16.msra.mxu3 %v2212_v61 }
 0x284   :  { %1540 = vmatpush.bf16.msra.mxu1 %v2220_v7 }
 0x287   :  { %v795_v8 = vpop.f32.mrf.mxu2 }
 0x288   :  { %v796_v9 = vadd.f32 %v2981_v34, %v795_v8 }
 0x28a   :  { %v822_v13 = vmax.f32 %v796_v9, 0.0 }
 0x28c   :  { %v3020_v14 = vpack.c.bf16 %v822_v13, %v821_v12  ;;  %v3048_v12 = vperm.slane %v3045_v6, 1  ;;  %v3051_v13 = vperm.slane %v3045_v6, 2 }
 0x28e   :  { %1267 = vmatmul.bf16.gmra.mxu3 %v3020_v14  ;;  %1316 = vmatmul.bf16.gmra.mxu0 %v3020_v14 }
 0x28f   :  { %1365 = vmatmul.bf16.gmra.mxu1 %v3020_v14  ;;  %1414 = vmatmul.bf16.gmra.mxu2 %v3020_v14 }
 0x291   :  { %v798_v0 = vpop.f32.mrf.mxu2 }
 0x292   :  { %v799_v2 = vadd.f32 %v2981_v34, %v798_v0 }
 0x294   :  { %v823_v29 = vmax.f32 %v799_v2, 0.0 }
 0x299   :  { %v800_v25 = vpop.f32.mrf.mxu2 }
 0x29a   :  { %v801_v28 = vadd.f32 %v2981_v34, %v800_v25 }
 0x29c   :  { %v824_v31 = vmax.f32 %v801_v28, 0.0 }
 0x29e   :  { %v3028_v10 = vpack.c.bf16 %v824_v31, %v823_v29 }
 0x2a0   :  { %1272 = vmatmul.bf16.gmra.mxu3 %v3028_v10  ;;  %1321 = vmatmul.bf16.gmra.mxu0 %v3028_v10 }
 0x2a1   :  { %1370 = vmatmul.bf16.gmra.mxu1 %v3028_v10  ;;  %1419 = vmatmul.bf16.gmra.mxu2 %v3028_v10 }
 0x2a5   :  { %v803_v38 = vpop.f32.mrf.mxu2 }
 0x2a6   :  { %v804_v47 = vadd.f32 %v2981_v34, %v803_v38 }
 0x2a8   :  { %v825_v52 = vmax.f32 %v804_v47, 0.0 }
 0x2ad   :  { %v805_v48 = vpop.f32.mrf.mxu2 }
 0x2ae   :  { %v806_v49 = vadd.f32 %v2981_v34, %v805_v48 }
 0x2b0   :  { %v826_v53 = vmax.f32 %v806_v49, 0.0 }
 0x2b1   :  { %v1297_v54 = vpop.f32.mrf.mxu0 }
 0x2b2   :  { %v1346_v57 = vpop.f32.mrf.mxu1  ;;  %v3036_v59 = vpack.c.bf16 %v826_v53, %v825_v52  ;;  %v1298_v16 = vadd.f32 %v1297_v54, %v3048_v12  ;;  %v3074_v53 = vperm.slane %v3045_v6, 3 }
 0x2b3   :  { %v1347_v18 = vadd.f32 %v1346_v57, %v3051_v13 }
 0x2b4   :  { %1277 = vmatmul.bf16.gmra.mxu3 %v3036_v59  ;;  %1326 = vmatmul.bf16.gmra.mxu0 %v3036_v59  ;;  %v1632_v22 = vmax.f32 %v1298_v16, 0.0 }
 0x2b5   :  { %1375 = vmatmul.bf16.gmra.mxu1 %v3036_v59  ;;  %1424 = vmatmul.bf16.gmra.mxu2 %v3036_v59  ;;  %v1633_v25 = vmax.f32 %v1347_v18, 0.0 }
 0x2b7   :  { %v1248_v3 = vpop.f32.mrf.mxu3 }
 0x2b8   :  { %v1249_v29 = vadd.f32 %v1248_v3, %v3058_v26 }
 0x2b9   :  { %v1299_v8 = vpop.f32.mrf.mxu0 }
 0x2ba   :  { %v1348_v9 = vpop.f32.mrf.mxu1  ;;  %v1300_v0 = vadd.f32 %v1299_v8, %v3048_v12  ;;  %v1631_v44 = vmax.f32 %v1249_v29, 0.0 }
 0x2bb   :  { %v1349_v15 = vadd.f32 %v1348_v9, %v3051_v13 }
 0x2bc   :  { %v1640_v19 = vmax.f32 %v1300_v0, 0.0 }
 0x2bd   :  { %v1641_v20 = vmax.f32 %v1349_v15, 0.0 }
 0x2be   :  { %v808_v27 = vpop.f32.mrf.mxu2  ;;  %v1774_v31 = vmax.f32 %v1632_v22, %v1640_v19 }
 0x2bf   :  { %v1250_v17 = vpop.f32.mrf.mxu3  ;;  %v1787_v32 = vmax.f32 %v1633_v25, %v1641_v20  ;;  %v809_v33 = vadd.f32 %v2981_v34, %v808_v27 }
 0x2c0   :  { %v1251_v23 = vadd.f32 %v1250_v17, %v3058_v26 }
 0x2c1   :  { %v827_v46 = vmax.f32 %v809_v33, 0.0 }
 0x2c2   :  { %v1302_v21 = vpop.f32.mrf.mxu0  ;;  %v1639_v36 = vmax.f32 %v1251_v23, 0.0 }
 0x2c3   :  { %v1303_v24 = vadd.f32 %v1302_v21, %v3048_v12  ;;  %v1351_v2 = vpop.f32.mrf.mxu1 }
 0x2c4   :  { %v1352_v28 = vadd.f32 %v1351_v2, %v3051_v13  ;;  %v1761_v48 = vmax.f32 %v1631_v44, %v1639_v36 }
 0x2c5   :  { %v1648_v41 = vmax.f32 %v1303_v24, 0.0 }
 0x2c6   :  { %v1649_v35 = vmax.f32 %v1352_v28, 0.0  ;;  %v810_v38 = vpop.f32.mrf.mxu2 }
 0x2c7   :  { %v1775_v37 = vmax.f32 %v1774_v31, %v1648_v41  ;;  %v811_v40 = vadd.f32 %v2981_v34, %v810_v38 }
 0x2c8   :  { %v1788_v39 = vmax.f32 %v1787_v32, %v1649_v35  ;;  %v1253_v43 = vpop.f32.mrf.mxu3 }
 0x2c9   :  { %v1254_v45 = vadd.f32 %v1253_v43, %v3058_v26  ;;  %v828_v47 = vmax.f32 %v811_v40, 0.0 }
 0x2ca   :  { %v1304_v54 = vpop.f32.mrf.mxu0 }
 0x2cb   :  { %v1647_v49 = vmax.f32 %v1254_v45, 0.0  ;;  %v3067_v50 = vpack.c.bf16 %v828_v47, %v827_v46  ;;  %v1353_v56 = vpop.f32.mrf.mxu1  ;;  %v1305_v11 = vadd.f32 %v1304_v54, %v3048_v12 }
 0x2cc   :  { %v1354_v61 = vadd.f32 %v1353_v56, %v3051_v13 }
 0x2cd   :  { %v1762_v51 = vmax.f32 %v1761_v48, %v1647_v49  ;;  %1282 = vmatmul.bf16.gmra.mxu3 %v3067_v50  ;;  %1331 = vmatmul.bf16.gmra.mxu0 %v3067_v50  ;;  %v1656_v3 = vmax.f32 %v1305_v11, 0.0 }
 0x2ce   :  { %1380 = vmatmul.bf16.gmra.mxu1 %v3067_v50  ;;  %1429 = vmatmul.bf16.gmra.mxu2 %v3067_v50  ;;  %v1395_v34 = vpop.f32.mrf.mxu2  ;;  %v1657_v7 = vmax.f32 %v1354_v61, 0.0 }
 0x2cf   :  { %v1396_v60 = vadd.f32 %v1395_v34, %v3074_v53  ;;  %v1776_v18 = vmax.f32 %v1775_v37, %v1656_v3 }
 0x2d0   :  { %v1255_v63 = vpop.f32.mrf.mxu3 }
 0x2d1   :  { %v1634_v4 = vmax.f32 %v1396_v60, 0.0  ;;  %v1256_v9 = vadd.f32 %v1255_v63, %v3058_v26 }
 0x2d3   :  { %v1655_v22 = vmax.f32 %v1256_v9, 0.0 }
 0x2d5   :  { %v1763_v29 = vmax.f32 %v1762_v51, %v1655_v22 }
 0x2d6   :  { %v1397_v52 = vpop.f32.mrf.mxu2 }
 0x2d7   :  { %v1398_v57 = vadd.f32 %v1397_v52, %v3074_v53 }
 0x2d9   :  { %v1642_v62 = vmax.f32 %v1398_v57, 0.0 }
 0x2db   :  { %v1800_v0 = vmax.f32 %v1634_v4, %v1642_v62 }
 0x2dd   :  { %1443 = vmatmul.bf16.vlgmr.msra.gmra.mxu3 %v2985_v42  ;;  %1492 = vmatmul.bf16.vlgmr.msra.gmra.mxu0 %v2985_v42 }
 0x2de   :  { %1541 = vmatmul.bf16.vlgmr.msra.gmra.mxu1 %v2985_v42  ;;  %1590 = vmatmul.bf16.vlgmr.msra.gmra.mxu2 %v2985_v42  ;;  %v1400_v1 = vpop.f32.mrf.mxu2  ;;  %v1789_v42 = vmax.f32 %v1788_v39, %v1657_v7 }
 0x2df   :  { %v1401_v5 = vadd.f32 %v1400_v1, %v3074_v53 }
 0x2e0   :  { %v1307_v8 = vpop.f32.mrf.mxu0 }
 0x2e1   :  { %v1650_v15 = vmax.f32 %v1401_v5, 0.0  ;;  %v1308_v16 = vadd.f32 %v1307_v8, %v3048_v12  ;;  %v1356_v27 = vpop.f32.mrf.mxu1 }
 0x2e2   :  { %v1357_v17 = vadd.f32 %v1356_v27, %v3051_v13 }
 0x2e3   :  { %v1801_v19 = vmax.f32 %v1800_v0, %v1650_v15  ;;  %v1664_v20 = vmax.f32 %v1308_v16, 0.0 }
 0x2e4   :  { %v1665_v21 = vmax.f32 %v1357_v17, 0.0 }
 0x2e5   :  { %v1777_v23 = vmax.f32 %v1776_v18, %v1664_v20 }
 0x2e6   :  { %v1790_v24 = vmax.f32 %v1789_v42, %v1665_v21  ;;  %v1258_v2 = vpop.f32.mrf.mxu3  ;;  %v1402_v25 = vpop.f32.mrf.mxu2 }
 0x2e7   :  { %v1259_v28 = vadd.f32 %v1258_v2, %v3058_v26  ;;  %v1403_v41 = vadd.f32 %v1402_v25, %v3074_v53 }
 0x2e8   :  { %v1309_v38 = vpop.f32.mrf.mxu0 }
 0x2e9   :  { %v1663_v31 = vmax.f32 %v1259_v28, 0.0  ;;  %v1658_v33 = vmax.f32 %v1403_v41, 0.0  ;;  %v1358_v40 = vpop.f32.mrf.mxu1  ;;  %v1310_v44 = vadd.f32 %v1309_v38, %v3048_v12 }
 0x2ea   :  { %v1359_v45 = vadd.f32 %v1358_v40, %v3051_v13 }
 0x2eb   :  { %v1764_v32 = vmax.f32 %v1763_v29, %v1663_v31  ;;  %v1802_v37 = vmax.f32 %v1801_v19, %v1658_v33  ;;  %v1672_v48 = vmax.f32 %v1310_v44, 0.0 }
 0x2ec   :  { %v1673_v49 = vmax.f32 %v1359_v45, 0.0 }
 0x2ed   :  { %1448 = vmatmul.bf16.gmra.mxu3 %v2995_v58  ;;  %1497 = vmatmul.bf16.gmra.mxu0 %v2995_v58  ;;  %v1778_v57 = vmax.f32 %v1777_v23, %v1672_v48 }
 0x2ee   :  { %1546 = vmatmul.bf16.gmra.mxu1 %v2995_v58  ;;  %1595 = vmatmul.bf16.gmra.mxu2 %v2995_v58  ;;  %v1405_v35 = vpop.f32.mrf.mxu2  ;;  %v1260_v47 = vpop.f32.mrf.mxu3  ;;  %v1791_v60 = vmax.f32 %v1790_v24, %v1673_v49 }
 0x2ef   :  { %v1406_v36 = vadd.f32 %v1405_v35, %v3074_v53  ;;  %v1261_v34 = vadd.f32 %v1260_v47, %v3058_v26 }
 0x2f1   :  { %v1666_v39 = vmax.f32 %v1406_v36, 0.0  ;;  %v1671_v62 = vmax.f32 %v1261_v34, 0.0 }
 0x2f3   :  { %v1803_v43 = vmax.f32 %v1802_v37, %v1666_v39  ;;  %v1765_v0 = vmax.f32 %v1764_v32, %v1671_v62 }
 0x2f6   :  { %v1407_v46 = vpop.f32.mrf.mxu2 }
 0x2f7   :  { %v1408_v54 = vadd.f32 %v1407_v46, %v3074_v53 }
 0x2f9   :  { %v1312_v51 = vpop.f32.mrf.mxu0  ;;  %v1674_v1 = vmax.f32 %v1408_v54, 0.0 }
 0x2fa   :  { %v1313_v58 = vadd.f32 %v1312_v51, %v3048_v12  ;;  %v1361_v52 = vpop.f32.mrf.mxu1 }
 0x2fb   :  { %v1362_v56 = vadd.f32 %v1361_v52, %v3051_v13  ;;  %v1804_v17 = vmax.f32 %v1803_v43, %v1674_v1 }
 0x2fc   :  { %v1680_v11 = vmax.f32 %v1313_v58, 0.0 }
 0x2fd   :  { %v1681_v61 = vmax.f32 %v1362_v56, 0.0  ;;  %1453 = vmatmul.bf16.gmra.mxu3 %v3004_v30  ;;  %1502 = vmatmul.bf16.gmra.mxu0 %v3004_v30 }
 0x2fe   :  { %v1779_v63 = vmax.f32 %v1778_v57, %v1680_v11  ;;  %1551 = vmatmul.bf16.gmra.mxu1 %v3004_v30  ;;  %1600 = vmatmul.bf16.gmra.mxu2 %v3004_v30 }
 0x2ff   :  { %v1792_v3 = vmax.f32 %v1791_v60, %v1681_v61  ;;  %v1263_v4 = vpop.f32.mrf.mxu3 }
 0x300   :  { %v1264_v5 = vadd.f32 %v1263_v4, %v3058_v26  ;;  %v1410_v7 = vpop.f32.mrf.mxu2 }
 0x301   :  { %v1411_v8 = vadd.f32 %v1410_v7, %v3074_v53  ;;  %v1314_v9 = vpop.f32.mrf.mxu0 }
 0x302   :  { %v1679_v15 = vmax.f32 %v1264_v5, 0.0  ;;  %v1315_v16 = vadd.f32 %v1314_v9, %v3048_v12  ;;  %v1363_v27 = vpop.f32.mrf.mxu1 }
 0x303   :  { %v1682_v18 = vmax.f32 %v1411_v8, 0.0  ;;  %v1364_v19 = vadd.f32 %v1363_v27, %v3051_v13 }
 0x304   :  { %v1766_v20 = vmax.f32 %v1765_v0, %v1679_v15  ;;  %v1688_v30 = vmax.f32 %v1315_v16, 0.0 }
 0x305   :  { %v1805_v42 = vmax.f32 %v1804_v17, %v1682_v18  ;;  %v1689_v21 = vmax.f32 %v1364_v19, 0.0 }
 0x306   :  { %v1780_v22 = vmax.f32 %v1779_v63, %v1688_v30 }
 0x307   :  { %v1793_v23 = vmax.f32 %v1792_v3, %v1689_v21  ;;  %v1265_v24 = vpop.f32.mrf.mxu3 }
 0x308   :  { %v1781_v2 = vrot.slane %v1780_v22, 4  ;;  %v1266_v25 = vadd.f32 %v1265_v24, %v3058_v26  ;;  %v1412_v28 = vpop.f32.mrf.mxu2 }
 0x309   :  { %v1794_v29 = vrot.slane %v1793_v23, 4  ;;  %v1413_v31 = vadd.f32 %v1412_v28, %v3074_v53 }
 0x30a   :  { %v1782_v41 = vmax.f32 %v1780_v22, %v1781_v2  ;;  %v1687_v32 = vmax.f32 %v1266_v25, 0.0 }
 0x30b   :  { %v1795_v33 = vmax.f32 %v1793_v23, %v1794_v29  ;;  %v1690_v35 = vmax.f32 %v1413_v31, 0.0  ;;  %v1317_v54 = vpop.f32.mrf.mxu0 }
 0x30c   :  { %v1783_v36 = vrot.slane %v1782_v41, 2  ;;  %v1767_v37 = vmax.f32 %v1766_v20, %v1687_v32  ;;  %v1366_v57 = vpop.f32.mrf.mxu1  ;;  %v1318_v29 = vadd.f32 %v1317_v54, %v3048_v12 }
 0x30d   :  { %v1796_v38 = vrot.slane %v1795_v33, 2  ;;  %v1806_v39 = vmax.f32 %v1805_v42, %v1690_v35  ;;  %1458 = vmatmul.bf16.gmra.mxu3 %v3012_v55  ;;  %1507 = vmatmul.bf16.gmra.mxu0 %v3012_v55  ;;  %v1367_v32 = vadd.f32 %v1366_v57, %v3051_v13 }
 0x30e   :  { %v1784_v40 = vmax.f32 %v1782_v41, %v1783_v36  ;;  %v1768_v43 = vrot.slane %v1767_v37, 4  ;;  %1556 = vmatmul.bf16.gmra.mxu1 %v3012_v55  ;;  %1605 = vmatmul.bf16.gmra.mxu2 %v3012_v55 }
 0x30f   :  { %v1797_v44 = vmax.f32 %v1795_v33, %v1796_v38  ;;  %v1807_v45 = vrot.slane %v1806_v39, 4 }
 0x310   :  { %v1785_v46 = vrot.slane %v1784_v40, 1  ;;  %v1769_v47 = vmax.f32 %v1767_v37, %v1768_v43 }
 0x311   :  { %v1808_v48 = vmax.f32 %v1806_v39, %v1807_v45  ;;  %v1798_v51 = vrot.slane %v1797_v44, 1  ;;  %v1268_v1 = vpop.f32.mrf.mxu3 }
 0x312   :  { %v1770_v49 = vrot.slane %v1769_v47, 2  ;;  %v1786_v58 = vmax.f32 %v1784_v40, %v1785_v46  ;;  %v1415_v7 = vpop.f32.mrf.mxu2  ;;  %v1269_v35 = vadd.f32 %v1268_v1, %v3058_v26  ;;  %v1696_v40 = vmax.f32 %v1318_v29, 0.0 }
 0x313   :  { %v1809_v34 = vrot.slane %v1808_v48, 2  ;;  %v1799_v60 = vmax.f32 %v1797_v44, %v1798_v51  ;;  %v1319_v9 = vpop.f32.mrf.mxu0  ;;  %v1416_v36 = vadd.f32 %v1415_v7, %v3074_v53  ;;  %v1697_v46 = vmax.f32 %v1367_v32, 0.0 }
 0x314   :  { %v1771_v52 = vmax.f32 %v1769_v47, %v1770_v49  ;;  %v1985_v62 = vrot.slane %v1786_v58, 6  ;;  %v1368_v15 = vpop.f32.mrf.mxu1  ;;  %v1320_v25 = vadd.f32 %v1319_v9, %v3048_v12 }
 0x315   :  { %v1810_v56 = vmax.f32 %v1808_v48, %v1809_v34  ;;  %v1986_v4 = vrot.slane %v1799_v60, 4  ;;  %v1695_v34 = vmax.f32 %v1269_v35, 0.0  ;;  %v1698_v58 = vmax.f32 %v1416_v36, 0.0 }
 0x316   :  { %v1772_v11 = vrot.slane %v1771_v52, 1  ;;  %v1704_v37 = vmax.f32 %v1320_v25, 0.0 }
 0x317   :  { %v1811_v61 = vrot.slane %v1810_v56, 1 }
 0x318   :  { %v1773_v63 = vmax.f32 %v1771_v52, %v1772_v11  ;;  %v1878_v57 = vmax.f32 %v1696_v40, %v1704_v37 }
 0x319   :  { %v1812_v55 = vmax.f32 %v1810_v56, %v1811_v61  ;;  %v1270_v16 = vpop.f32.mrf.mxu3 }
 0x31a   :  { %v1998_v3 = vsel %vm1997_vm1, %v1773_v63, %v1985_v62  ;;  %v1417_v27 = vpop.f32.mrf.mxu2  ;;  %v1271_v31 = vadd.f32 %v1270_v16, %v3058_v26 }
 0x31b   :  { %v1987_v5 = vrot.slane %v1812_v55, 2  ;;  %v1418_v33 = vadd.f32 %v1417_v27, %v3074_v53 }
 0x31c   :  { %v1703_v43 = vmax.f32 %v1271_v31, 0.0 }
 0x31d   :  { %1463 = vmatmul.bf16.gmra.mxu3 %v3020_v14  ;;  %1512 = vmatmul.bf16.gmra.mxu0 %v3020_v14  ;;  %v2000_v8 = vsel %vm1999_vm2, %v1986_v4, %v1987_v5  ;;  %v1322_v17 = vpop.f32.mrf.mxu0  ;;  %v1706_v47 = vmax.f32 %v1418_v33, 0.0 }
 0x31e   :  { %1561 = vmatmul.bf16.gmra.mxu1 %v3020_v14  ;;  %1610 = vmatmul.bf16.gmra.mxu2 %v3020_v14  ;;  %v3122_v0 = vsel %vm2001_vm3, %v1998_v3, %v2000_v8  ;;  %v1371_v18 = vpop.f32.mrf.mxu1  ;;  %v1865_v63 = vmax.f32 %v1695_v34, %v1703_v43 }
 0x31f   :  { %v1372_v39 = vadd.f32 %v1371_v18, %v3051_v13  ;;  %v1904_v5 = vmax.f32 %v1698_v58, %v1706_v47 }
 0x321   :  { %v1713_v60 = vmax.f32 %v1372_v39, 0.0 }
 0x323   :  { %v1273_v19 = vpop.f32.mrf.mxu3 }
 0x324   :  { %v1420_v20 = vpop.f32.mrf.mxu2  ;;  %v1274_v44 = vadd.f32 %v1273_v19, %v3058_v26 }
 0x325   :  { %v1324_v30 = vpop.f32.mrf.mxu0  ;;  %v1421_v48 = vadd.f32 %v1420_v20, %v3074_v53 }
 0x326   :  { %v1373_v14 = vpop.f32.mrf.mxu1  ;;  %v1325_v45 = vadd.f32 %v1324_v30, %v3048_v12  ;;  %v1711_v55 = vmax.f32 %v1274_v44, 0.0 }
 0x327   :  { %v1374_v49 = vadd.f32 %v1373_v14, %v3051_v13  ;;  %v1714_v7 = vmax.f32 %v1421_v48, 0.0 }
 0x328   :  { %v1720_v1 = vmax.f32 %v1325_v45, 0.0  ;;  %v1866_v14 = vmax.f32 %v1865_v63, %v1711_v55 }
 0x329   :  { %v1721_v8 = vmax.f32 %v1374_v49, 0.0  ;;  %v1905_v25 = vmax.f32 %v1904_v5, %v1714_v7 }
 0x32b   :  { %v1275_v42 = vpop.f32.mrf.mxu3 }
 0x32c   :  { %v1422_v21 = vpop.f32.mrf.mxu2  ;;  %v1276_v16 = vadd.f32 %v1275_v42, %v3058_v26 }
 0x32d   :  { %1468 = vmatmul.bf16.gmra.mxu3 %v3028_v10  ;;  %1517 = vmatmul.bf16.gmra.mxu0 %v3028_v10  ;;  %v1423_v19 = vadd.f32 %v1422_v21, %v3074_v53 }
 0x32e   :  { %1566 = vmatmul.bf16.gmra.mxu1 %v3028_v10  ;;  %1615 = vmatmul.bf16.gmra.mxu2 %v3028_v10  ;;  %v1369_v10 = vadd.f32 %v1368_v15, %v3051_v13 }
 0x32f   :  { %v1722_v36 = vmax.f32 %v1423_v19, 0.0 }
 0x330   :  { %v1705_v38 = vmax.f32 %v1369_v10, 0.0 }
 0x331   :  { %v1327_v22 = vpop.f32.mrf.mxu0  ;;  %v1906_v58 = vmax.f32 %v1905_v25, %v1722_v36 }
 0x332   :  { %v1376_v23 = vpop.f32.mrf.mxu1  ;;  %v1328_v54 = vadd.f32 %v1327_v22, %v3048_v12  ;;  %v1891_v11 = vmax.f32 %v1697_v46, %v1705_v38 }
 0x333   :  { %v1377_v61 = vadd.f32 %v1376_v23, %v3051_v13 }
 0x334   :  { %v1728_v27 = vmax.f32 %v1328_v54, 0.0  ;;  %v1892_v18 = vmax.f32 %v1891_v11, %v1713_v60 }
 0x335   :  { %v1729_v20 = vmax.f32 %v1377_v61, 0.0 }
 0x336   :  { %v1893_v10 = vmax.f32 %v1892_v18, %v1721_v8 }
 0x337   :  { %v1278_v24 = vpop.f32.mrf.mxu3 }
 0x338   :  { %v1425_v2 = vpop.f32.mrf.mxu2  ;;  %v1279_v42 = vadd.f32 %v1278_v24, %v3058_v26 }
 0x339   :  { %v1329_v28 = vpop.f32.mrf.mxu0 }
 0x33a   :  { %v1378_v41 = vpop.f32.mrf.mxu1  ;;  %v1330_v3 = vadd.f32 %v1329_v28, %v3048_v12  ;;  %v1426_v28 = vadd.f32 %v1425_v2, %v3074_v53  ;;  %v1727_v24 = vmax.f32 %v1279_v42, 0.0  ;;  %v3172_v42 = vperm.slane %v3045_v6, 6 }
 0x33b   :  { %v1379_v9 = vadd.f32 %v1378_v41, %v3051_v13  ;;  %v1719_v41 = vmax.f32 %v1276_v16, 0.0 }
 0x33c   :  { %v1736_v23 = vmax.f32 %v1330_v3, 0.0  ;;  %v1730_v44 = vmax.f32 %v1426_v28, 0.0 }
 0x33d   :  { %1473 = vmatmul.bf16.gmra.mxu3 %v3036_v59  ;;  %1522 = vmatmul.bf16.gmra.mxu0 %v3036_v59  ;;  %v1737_v29 = vmax.f32 %v1379_v9, 0.0  ;;  %v1867_v48 = vmax.f32 %v1866_v14, %v1719_v41  ;;  %v3169_v14 = vperm.slane %v3045_v6, 5 }
 0x33e   :  { %1571 = vmatmul.bf16.gmra.mxu1 %v3036_v59  ;;  %1620 = vmatmul.bf16.gmra.mxu2 %v3036_v59  ;;  %v1323_v59 = vadd.f32 %v1322_v17, %v3048_v12  ;;  %v1907_v61 = vmax.f32 %v1906_v58, %v1730_v44 }
 0x33f   :  { %v1280_v51 = vpop.f32.mrf.mxu3 }
 0x340   :  { %v1712_v52 = vmax.f32 %v1323_v59, 0.0  ;;  %v1427_v56 = vpop.f32.mrf.mxu2  ;;  %v1281_v32 = vadd.f32 %v1280_v51, %v3058_v26  ;;  %v1894_v59 = vmax.f32 %v1893_v10, %v1729_v20 }
 0x342   :  { %v1879_v15 = vmax.f32 %v1878_v57, %v1712_v52  ;;  %v1895_v45 = vmax.f32 %v1894_v59, %v1737_v29  ;;  %v1735_v49 = vmax.f32 %v1281_v32, 0.0  ;;  %v1868_v57 = vmax.f32 %v1867_v48, %v1727_v24 }
 0x344   :  { %v1880_v22 = vmax.f32 %v1879_v15, %v1720_v1  ;;  %v1869_v55 = vmax.f32 %v1868_v57, %v1735_v49 }
 0x346   :  { %v1881_v21 = vmax.f32 %v1880_v22, %v1728_v27 }
 0x348   :  { %v1882_v39 = vmax.f32 %v1881_v21, %v1736_v23 }
 0x34a   :  { %v1332_v62 = vpop.f32.mrf.mxu0 }
 0x34b   :  { %v1381_v4 = vpop.f32.mrf.mxu1  ;;  %v1333_v17 = vadd.f32 %v1332_v62, %v3048_v12 }
 0x34c   :  { %v1382_v30 = vadd.f32 %v1381_v4, %v3051_v13 }
 0x34d   :  { %1478 = vmatmul.bf16.gmra.mxu3 %v3067_v50  ;;  %1527 = vmatmul.bf16.gmra.mxu0 %v3067_v50  ;;  %v1744_v33 = vmax.f32 %v1333_v17, 0.0 }
 0x34e   :  { %1576 = vmatmul.bf16.gmra.mxu1 %v3067_v50  ;;  %1625 = vmatmul.bf16.gmra.mxu2 %v3067_v50  ;;  %v1428_v50 = vadd.f32 %v1427_v56, %v3074_v53  ;;  %v1745_v37 = vmax.f32 %v1382_v30, 0.0 }
 0x34f   :  { %v1883_v51 = vmax.f32 %v1882_v39, %v1744_v33  ;;  %v3177_v33 = vperm.slane %v3045_v6, 4 }
 0x350   :  { %v1283_v31 = vpop.f32.mrf.mxu3  ;;  %v1738_v52 = vmax.f32 %v1428_v50, 0.0  ;;  %v1896_v54 = vmax.f32 %v1895_v45, %v1745_v37  ;;  %v3180_v50 = vperm.slane %v3045_v6, 7 }
 0x351   :  { %v1430_v35 = vpop.f32.mrf.mxu2  ;;  %v1284_v40 = vadd.f32 %v1283_v31, %v3058_v26 }
 0x352   :  { %v1334_v38 = vpop.f32.mrf.mxu0  ;;  %v1431_v46 = vadd.f32 %v1430_v35, %v3074_v53  ;;  %v1908_v4 = vmax.f32 %v1907_v61, %v1738_v52 }
 0x353   :  { %v1335_v2 = vadd.f32 %v1334_v38, %v3048_v12  ;;  %v1383_v43 = vpop.f32.mrf.mxu1  ;;  %v1743_v11 = vmax.f32 %v1284_v40, 0.0 }
 0x354   :  { %v1384_v47 = vadd.f32 %v1383_v43, %v3051_v13  ;;  %v1746_v12 = vmax.f32 %v1431_v46, 0.0 }
 0x355   :  { %v1752_v34 = vmax.f32 %v1335_v2, 0.0  ;;  %v1870_v9 = vmax.f32 %v1869_v55, %v1743_v11 }
 0x356   :  { %v1753_v56 = vmax.f32 %v1384_v47, 0.0  ;;  %v1909_v17 = vmax.f32 %v1908_v4, %v1746_v12 }
 0x357   :  { %v1884_v60 = vmax.f32 %v1883_v51, %v1752_v34 }
 0x358   :  { %v1897_v62 = vmax.f32 %v1896_v54, %v1753_v56  ;;  %v1285_v63 = vpop.f32.mrf.mxu3 }
 0x359   :  { %v1885_v1 = vrot.slane %v1884_v60, 4  ;;  %v1286_v3 = vadd.f32 %v1285_v63, %v3058_v26  ;;  %v1432_v13 = vpop.f32.mrf.mxu2 }
 0x35a   :  { %v1898_v5 = vrot.slane %v1897_v62, 4  ;;  %v1433_v7 = vadd.f32 %v1432_v13, %v3074_v53  ;;  %v1493_v8 = vpop.f32.mrf.mxu0 }
 0x35b   :  { %v1886_v15 = vmax.f32 %v1884_v60, %v1885_v1  ;;  %v1751_v16 = vmax.f32 %v1286_v3, 0.0  ;;  %v1542_v27 = vpop.f32.mrf.mxu1  ;;  %v1494_v31 = vadd.f32 %v1493_v8, %v3169_v14 }
 0x35c   :  { %v1899_v18 = vmax.f32 %v1897_v62, %v1898_v5  ;;  %v1754_v19 = vmax.f32 %v1433_v7, 0.0  ;;  %v1543_v32 = vadd.f32 %v1542_v27, %v3172_v42 }
 0x35d   :  { %v1887_v20 = vrot.slane %v1886_v15, 2  ;;  %v1871_v30 = vmax.f32 %v1870_v9, %v1751_v16  ;;  %v1636_v43 = vmax.f32 %v1494_v31, 0.0 }
 0x35e   :  { %v1900_v22 = vrot.slane %v1899_v18, 2  ;;  %v1910_v26 = vmax.f32 %v1909_v17, %v1754_v19  ;;  %v1637_v46 = vmax.f32 %v1543_v32, 0.0 }
 0x35f   :  { %v1888_v23 = vmax.f32 %v1886_v15, %v1887_v20  ;;  %v1872_v53 = vrot.slane %v1871_v30, 4 }
 0x360   :  { %v1901_v25 = vmax.f32 %v1899_v18, %v1900_v22  ;;  %v1911_v10 = vrot.slane %v1910_v26, 4  ;;  %v1444_v28 = vpop.f32.mrf.mxu3 }
 0x361   :  { %v1873_v29 = vmax.f32 %v1871_v30, %v1872_v53  ;;  %v1591_v41 = vpop.f32.mrf.mxu2  ;;  %v1889_v36 = vrot.slane %v1888_v23, 1  ;;  %v1445_v47 = vadd.f32 %v1444_v28, %v3177_v33 }
 0x362   :  { %v1912_v21 = vmax.f32 %v1910_v26, %v1911_v10  ;;  %v1495_v35 = vpop.f32.mrf.mxu0  ;;  %v1902_v24 = vrot.slane %v1901_v25, 1  ;;  %v1592_v6 = vadd.f32 %v1591_v41, %v3180_v50 }
 0x363   :  { %v1874_v59 = vrot.slane %v1873_v29, 2  ;;  %v1496_v37 = vadd.f32 %v1495_v35, %v3169_v14  ;;  %v1544_v38 = vpop.f32.mrf.mxu1  ;;  %v1890_v49 = vmax.f32 %v1888_v23, %v1889_v36  ;;  %v1635_v12 = vmax.f32 %v1445_v47, 0.0 }
 0x364   :  { %v1913_v39 = vrot.slane %v1912_v21, 2  ;;  %v1545_v40 = vadd.f32 %v1544_v38, %v3172_v42  ;;  %v1903_v58 = vmax.f32 %v1901_v25, %v1902_v24  ;;  %v1638_v1 = vmax.f32 %v1592_v6, 0.0 }
 0x365   :  { %v1875_v2 = vmax.f32 %v1873_v29, %v1874_v59  ;;  %v1644_v44 = vmax.f32 %v1496_v37, 0.0  ;;  %v1991_v55 = vrot.slane %v1890_v49, 6 }
 0x366   :  { %v1914_v45 = vmax.f32 %v1912_v21, %v1913_v39  ;;  %v1645_v48 = vmax.f32 %v1545_v40, 0.0  ;;  %v1992_v5 = vrot.slane %v1903_v58, 4 }
 0x367   :  { %v1876_v51 = vrot.slane %v1875_v2, 1  ;;  %v1826_v34 = vmax.f32 %v1636_v43, %v1644_v44 }
 0x368   :  { %v1915_v52 = vrot.slane %v1914_v45, 1  ;;  %v1839_v54 = vmax.f32 %v1637_v46, %v1645_v48  ;;  %v1446_v56 = vpop.f32.mrf.mxu3 }
 0x369   :  { %v1447_v57 = vadd.f32 %v1446_v56, %v3177_v33  ;;  %v1593_v11 = vpop.f32.mrf.mxu2  ;;  %v1877_v60 = vmax.f32 %v1875_v2, %v1876_v51 }
 0x36a   :  { %v1916_v61 = vmax.f32 %v1914_v45, %v1915_v52  ;;  %v1594_v62 = vadd.f32 %v1593_v11, %v3180_v50  ;;  %v1498_v63 = vpop.f32.mrf.mxu0 }
 0x36b   :  { %v1643_v3 = vmax.f32 %v1447_v57, 0.0  ;;  %v1499_v13 = vadd.f32 %v1498_v63, %v3169_v14  ;;  %v1547_v4 = vpop.f32.mrf.mxu1  ;;  %v2006_v18 = vsel %vm1997_vm1, %v1877_v60, %v1991_v55 }
 0x36c   :  { %v1993_v7 = vrot.slane %v1916_v61, 2  ;;  %v1646_v8 = vmax.f32 %v1594_v62, 0.0  ;;  %v1548_v9 = vadd.f32 %v1547_v4, %v3172_v42 }
 0x36d   :  { %v1813_v15 = vmax.f32 %v1635_v12, %v1643_v3  ;;  %v1652_v16 = vmax.f32 %v1499_v13, 0.0 }
 0x36e   :  { %v1852_v27 = vmax.f32 %v1638_v1, %v1646_v8  ;;  %v1653_v17 = vmax.f32 %v1548_v9, 0.0  ;;  %v2007_v19 = vsel %vm1999_vm2, %v1992_v5, %v1993_v7 }
 0x36f   :  { %v1827_v20 = vmax.f32 %v1826_v34, %v1652_v16  ;;  %v2008_v30 = vsel %vm2001_vm3, %v2006_v18, %v2007_v19 }
 0x370   :  { %v1840_v22 = vmax.f32 %v1839_v54, %v1653_v17  ;;  %v1449_v26 = vpop.f32.mrf.mxu3  ;;  %v2017_v23 = vrot.slane %v2008_v30, 7 }
 0x371   :  { %v1450_v53 = vadd.f32 %v1449_v26, %v3177_v33  ;;  %v1596_v25 = vpop.f32.mrf.mxu2 }
 0x372   :  { %v1597_v10 = vadd.f32 %v1596_v25, %v3180_v50  ;;  %v1500_v28 = vpop.f32.mrf.mxu0  ;;  %v2019_v29 = vsel %vm2018_vm4, %v2017_v23, %v3122_v0 }
 0x373   :  { %v1651_v31 = vmax.f32 %v1450_v53, 0.0  ;;  %v1501_v41 = vadd.f32 %v1500_v28, %v3169_v14  ;;  %v1549_v21 = vpop.f32.mrf.mxu1  ;;  %v2021_v32 = vsel %vm2020_vm5, %v2017_v23, %v2019_v29 }
 0x374   :  { %v1654_v35 = vmax.f32 %v1597_v10, 0.0  ;;  %v1550_v36 = vadd.f32 %v1549_v21, %v3172_v42  ;;  %v2023_v59 = vsel %vm2022_vm6, %v2017_v23, %v2021_v32 }
 0x375   :  { %v1814_v37 = vmax.f32 %v1813_v15, %v1651_v31  ;;  %v1660_v38 = vmax.f32 %v1501_v41, 0.0  ;;  %v2025_v24 = vsel %vm2024_vm7, %v2017_v23, %v2023_v59 }
 0x376   :  { %v1853_v39 = vmax.f32 %v1852_v27, %v1654_v35  ;;  %v1661_v40 = vmax.f32 %v1550_v36, 0.0  ;;  %v2035_v2 = vmax.f32 %v2025_v24, 0.0 }
 0x377   :  { %v1828_v0 = vmax.f32 %v1827_v20, %v1660_v38 }
 0x378   :  { %v1841_v43 = vmax.f32 %v1840_v22, %v1661_v40  ;;  %v1451_v44 = vpop.f32.mrf.mxu3  ;;  %2046 = vst [vmem:[#allocation1] ss:$4 sm:$0xff] %v2035_v2 }
 0x379   :  { %v1452_v45 = vadd.f32 %v1451_v44, %v3177_v33  ;;  %v1598_v46 = vpop.f32.mrf.mxu2 }
 0x37a   :  { %v1599_v47 = vadd.f32 %v1598_v46, %v3180_v50  ;;  %v1503_v48 = vpop.f32.mrf.mxu0 }
 0x37b   :  { %v1659_v49 = vmax.f32 %v1452_v45, 0.0  ;;  %v1504_v51 = vadd.f32 %v1503_v48, %v3169_v14  ;;  %v1552_v6 = vpop.f32.mrf.mxu1 }
 0x37c   :  { %v1662_v34 = vmax.f32 %v1599_v47, 0.0  ;;  %v1553_v58 = vadd.f32 %v1552_v6, %v3172_v42 }
 0x37d   :  { %v1815_v52 = vmax.f32 %v1814_v37, %v1659_v49  ;;  %v1668_v54 = vmax.f32 %v1504_v51, 0.0 }
 0x37e   :  { %v1854_v56 = vmax.f32 %v1853_v39, %v1662_v34  ;;  %v1669_v57 = vmax.f32 %v1553_v58, 0.0 }
 0x37f   :  { %v1829_v11 = vmax.f32 %v1828_v0, %v1668_v54 }
 0x380   :  { %v1842_v60 = vmax.f32 %v1841_v43, %v1669_v57  ;;  %v1454_v61 = vpop.f32.mrf.mxu3 }
 0x381   :  { %v1455_v12 = vadd.f32 %v1454_v61, %v3177_v33  ;;  %v1601_v62 = vpop.f32.mrf.mxu2 }
 0x382   :  { %v1602_v63 = vadd.f32 %v1601_v62, %v3180_v50  ;;  %v1505_v55 = vpop.f32.mrf.mxu0 }
 0x383   :  { %v1667_v1 = vmax.f32 %v1455_v12, 0.0  ;;  %v1506_v3 = vadd.f32 %v1505_v55, %v3169_v14  ;;  %v1554_v13 = vpop.f32.mrf.mxu1 }
 0x384   :  { %v1670_v4 = vmax.f32 %v1602_v63, 0.0  ;;  %v1555_v5 = vadd.f32 %v1554_v13, %v3172_v42 }
 0x385   :  { %v1816_v7 = vmax.f32 %v1815_v52, %v1667_v1  ;;  %v1676_v8 = vmax.f32 %v1506_v3, 0.0 }
 0x386   :  { %v1855_v9 = vmax.f32 %v1854_v56, %v1670_v4  ;;  %v1677_v15 = vmax.f32 %v1555_v5, 0.0 }
 0x387   :  { %v1830_v16 = vmax.f32 %v1829_v11, %v1676_v8 }
 0x388   :  { %v1843_v27 = vmax.f32 %v1842_v60, %v1677_v15  ;;  %v1456_v17 = vpop.f32.mrf.mxu3 }
 0x389   :  { %v1457_v18 = vadd.f32 %v1456_v17, %v3177_v33  ;;  %v1603_v19 = vpop.f32.mrf.mxu2 }
 0x38a   :  { %v1604_v20 = vadd.f32 %v1603_v19, %v3180_v50  ;;  %v1508_v30 = vpop.f32.mrf.mxu0 }
 0x38b   :  { %v1675_v22 = vmax.f32 %v1457_v18, 0.0  ;;  %v1509_v26 = vadd.f32 %v1508_v30, %v3169_v14  ;;  %v1557_v23 = vpop.f32.mrf.mxu1 }
 0x38c   :  { %v1678_v53 = vmax.f32 %v1604_v20, 0.0  ;;  %v1558_v25 = vadd.f32 %v1557_v23, %v3172_v42 }
 0x38d   :  { %v1817_v10 = vmax.f32 %v1816_v7, %v1675_v22  ;;  %v1684_v28 = vmax.f32 %v1509_v26, 0.0 }
 0x38e   :  { %v1856_v29 = vmax.f32 %v1855_v9, %v1678_v53  ;;  %v1685_v31 = vmax.f32 %v1558_v25, 0.0 }
 0x38f   :  { %v1831_v41 = vmax.f32 %v1830_v16, %v1684_v28 }
 0x390   :  { %v1844_v21 = vmax.f32 %v1843_v27, %v1685_v31  ;;  %v1459_v32 = vpop.f32.mrf.mxu3 }
 0x391   :  { %v1460_v35 = vadd.f32 %v1459_v32, %v3177_v33  ;;  %v1606_v36 = vpop.f32.mrf.mxu2 }
 0x392   :  { %v1607_v59 = vadd.f32 %v1606_v36, %v3180_v50  ;;  %v1510_v37 = vpop.f32.mrf.mxu0 }
 0x393   :  { %v1683_v38 = vmax.f32 %v1460_v35, 0.0  ;;  %v1511_v24 = vadd.f32 %v1510_v37, %v3169_v14  ;;  %v1559_v39 = vpop.f32.mrf.mxu1 }
 0x394   :  { %v1686_v40 = vmax.f32 %v1607_v59, 0.0  ;;  %v1560_v2 = vadd.f32 %v1559_v39, %v3172_v42 }
 0x395   :  { %v1818_v0 = vmax.f32 %v1817_v10, %v1683_v38  ;;  %v1692_v43 = vmax.f32 %v1511_v24, 0.0 }
 0x396   :  { %v1857_v44 = vmax.f32 %v1856_v29, %v1686_v40  ;;  %v1693_v45 = vmax.f32 %v1560_v2, 0.0 }
 0x397   :  { %v1832_v46 = vmax.f32 %v1831_v41, %v1692_v43 }
 0x398   :  { %v1845_v47 = vmax.f32 %v1844_v21, %v1693_v45  ;;  %v1461_v48 = vpop.f32.mrf.mxu3 }
 0x399   :  { %v1833_v49 = vrot.slane %v1832_v46, 4  ;;  %v1462_v51 = vadd.f32 %v1461_v48, %v3177_v33  ;;  %v1608_v6 = vpop.f32.mrf.mxu2 }
 0x39a   :  { %v1846_v34 = vrot.slane %v1845_v47, 4  ;;  %v1609_v58 = vadd.f32 %v1608_v6, %v3180_v50  ;;  %v1513_v52 = vpop.f32.mrf.mxu0 }
 0x39b   :  { %v1834_v54 = vmax.f32 %v1832_v46, %v1833_v49  ;;  %v1691_v56 = vmax.f32 %v1462_v51, 0.0  ;;  %v1562_v57 = vpop.f32.mrf.mxu1  ;;  %v1514_v49 = vadd.f32 %v1513_v52, %v3169_v14 }
 0x39c   :  { %v1847_v11 = vmax.f32 %v1845_v47, %v1846_v34  ;;  %v1694_v60 = vmax.f32 %v1609_v58, 0.0  ;;  %v1563_v34 = vadd.f32 %v1562_v57, %v3172_v42 }
 0x39d   :  { %v1835_v61 = vrot.slane %v1834_v54, 2  ;;  %v1819_v12 = vmax.f32 %v1818_v0, %v1691_v56 }
 0x39e   :  { %v1848_v62 = vrot.slane %v1847_v11, 2  ;;  %v1858_v63 = vmax.f32 %v1857_v44, %v1694_v60 }
 0x39f   :  { %v1836_v55 = vmax.f32 %v1834_v54, %v1835_v61  ;;  %v1820_v1 = vrot.slane %v1819_v12, 4 }
 0x3a0   :  { %v1849_v3 = vmax.f32 %v1847_v11, %v1848_v62  ;;  %v1859_v13 = vrot.slane %v1858_v63, 4  ;;  %v1464_v4 = vpop.f32.mrf.mxu3  ;;  %v1700_v62 = vmax.f32 %v1514_v49, 0.0 }
 0x3a1   :  { %v1837_v5 = vrot.slane %v1836_v55, 1  ;;  %v1821_v7 = vmax.f32 %v1819_v12, %v1820_v1  ;;  %v1611_v8 = vpop.f32.mrf.mxu2  ;;  %v1465_v54 = vadd.f32 %v1464_v4, %v3177_v33  ;;  %v1701_v1 = vmax.f32 %v1563_v34, 0.0 }
 0x3a2   :  { %v1860_v9 = vmax.f32 %v1858_v63, %v1859_v13  ;;  %v1515_v15 = vpop.f32.mrf.mxu0  ;;  %v1850_v17 = vrot.slane %v1849_v3, 1  ;;  %v1612_v56 = vadd.f32 %v1611_v8, %v3180_v50 }
 0x3a3   :  { %v1822_v16 = vrot.slane %v1821_v7, 2  ;;  %v1564_v27 = vpop.f32.mrf.mxu1  ;;  %v1838_v19 = vmax.f32 %v1836_v55, %v1837_v5  ;;  %v1516_v46 = vadd.f32 %v1515_v15, %v3169_v14  ;;  %v1699_v5 = vmax.f32 %v1465_v54, 0.0 }
 0x3a4   :  { %v1861_v18 = vrot.slane %v1860_v9, 2  ;;  %v1851_v26 = vmax.f32 %v1849_v3, %v1850_v17  ;;  %v1565_v47 = vadd.f32 %v1564_v27, %v3172_v42 }
 0x3a5   :  { %v1823_v20 = vmax.f32 %v1821_v7, %v1822_v16  ;;  %v1988_v25 = vrot.slane %v1838_v19, 6  ;;  %v1708_v60 = vmax.f32 %v1516_v46, 0.0  ;;  %v1702_v7 = vmax.f32 %v1612_v56, 0.0 }
 0x3a6   :  { %v1862_v30 = vmax.f32 %v1860_v9, %v1861_v18  ;;  %v1989_v32 = vrot.slane %v1851_v26, 4  ;;  %v1709_v61 = vmax.f32 %v1565_v47, 0.0 }
 0x3a7   :  { %v1824_v22 = vrot.slane %v1823_v20, 1  ;;  %v1930_v16 = vmax.f32 %v1700_v62, %v1708_v60 }
 0x3a8   :  { %v1863_v23 = vrot.slane %v1862_v30, 1  ;;  %v1466_v53 = vpop.f32.mrf.mxu3  ;;  %v1943_v27 = vmax.f32 %v1701_v1, %v1709_v61 }
 0x3a9   :  { %v1825_v10 = vmax.f32 %v1823_v20, %v1824_v22  ;;  %v1613_v28 = vpop.f32.mrf.mxu2  ;;  %v1467_v51 = vadd.f32 %v1466_v53, %v3177_v33 }
 0x3aa   :  { %v1864_v29 = vmax.f32 %v1862_v30, %v1863_v23  ;;  %v1518_v31 = vpop.f32.mrf.mxu0  ;;  %v1614_v58 = vadd.f32 %v1613_v28, %v3180_v50 }
 0x3ab   :  { %v1567_v41 = vpop.f32.mrf.mxu1  ;;  %v2003_v21 = vsel %vm1997_vm1, %v1825_v10, %v1988_v25  ;;  %v1519_v11 = vadd.f32 %v1518_v31, %v3169_v14  ;;  %v1707_v63 = vmax.f32 %v1467_v51, 0.0 }
 0x3ac   :  { %v1990_v35 = vrot.slane %v1864_v29, 2  ;;  %v1568_v12 = vadd.f32 %v1567_v41, %v3172_v42  ;;  %v1710_v57 = vmax.f32 %v1614_v58, 0.0 }
 0x3ad   :  { %v1716_v8 = vmax.f32 %v1519_v11, 0.0  ;;  %v1917_v20 = vmax.f32 %v1699_v5, %v1707_v63 }
 0x3ae   :  { %v2004_v36 = vsel %vm1999_vm2, %v1989_v32, %v1990_v35  ;;  %v1717_v17 = vmax.f32 %v1568_v12, 0.0  ;;  %v1956_v53 = vmax.f32 %v1702_v7, %v1710_v57 }
 0x3af   :  { %v3223_v59 = vsel %vm2001_vm3, %v2003_v21, %v2004_v36  ;;  %v1931_v29 = vmax.f32 %v1930_v16, %v1716_v8 }
 0x3b0   :  { %v1469_v37 = vpop.f32.mrf.mxu3  ;;  %v1944_v32 = vmax.f32 %v1943_v27, %v1717_v17 }
 0x3b1   :  { %v1616_v38 = vpop.f32.mrf.mxu2  ;;  %v1470_v52 = vadd.f32 %v1469_v37, %v3177_v33 }
 0x3b2   :  { %v1520_v24 = vpop.f32.mrf.mxu0  ;;  %v1617_v3 = vadd.f32 %v1616_v38, %v3180_v50 }
 0x3b3   :  { %v1569_v39 = vpop.f32.mrf.mxu1  ;;  %v1521_v55 = vadd.f32 %v1520_v24, %v3169_v14  ;;  %v1715_v30 = vmax.f32 %v1470_v52, 0.0 }
 0x3b4   :  { %v1570_v13 = vadd.f32 %v1569_v39, %v3172_v42  ;;  %v1718_v25 = vmax.f32 %v1617_v3, 0.0 }
 0x3b5   :  { %v1724_v22 = vmax.f32 %v1521_v55, 0.0  ;;  %v1918_v38 = vmax.f32 %v1917_v20, %v1715_v30 }
 0x3b6   :  { %v1725_v10 = vmax.f32 %v1570_v13, 0.0 }
 0x3b7   :  { %v1932_v24 = vmax.f32 %v1931_v29, %v1724_v22 }
 0x3b8   :  { %v1471_v40 = vpop.f32.mrf.mxu3  ;;  %v1945_v46 = vmax.f32 %v1944_v32, %v1725_v10 }
 0x3b9   :  { %v1618_v2 = vpop.f32.mrf.mxu2  ;;  %v1472_v31 = vadd.f32 %v1471_v40, %v3177_v33 }
 0x3ba   :  { %v1523_v0 = vpop.f32.mrf.mxu0  ;;  %v1619_v35 = vadd.f32 %v1618_v2, %v3180_v50 }
 0x3bb   :  { %v1572_v43 = vpop.f32.mrf.mxu1  ;;  %v1524_v9 = vadd.f32 %v1523_v0, %v3169_v14  ;;  %v1723_v49 = vmax.f32 %v1472_v31, 0.0 }
 0x3bc   :  { %v1573_v18 = vadd.f32 %v1572_v43, %v3172_v42  ;;  %v1957_v43 = vmax.f32 %v1956_v53, %v1718_v25  ;;  %v1726_v58 = vmax.f32 %v1619_v35, 0.0 }
 0x3bd   :  { %v1732_v41 = vmax.f32 %v1524_v9, 0.0  ;;  %v1919_v57 = vmax.f32 %v1918_v38, %v1723_v49 }
 0x3be   :  { %v1733_v36 = vmax.f32 %v1573_v18, 0.0  ;;  %v1958_v5 = vmax.f32 %v1957_v43, %v1726_v58 }
 0x3bf   :  { %v1933_v51 = vmax.f32 %v1932_v24, %v1732_v41 }
 0x3c0   :  { %v1474_v44 = vpop.f32.mrf.mxu3  ;;  %v1946_v54 = vmax.f32 %v1945_v46, %v1733_v36 }
 0x3c1   :  { %v1621_v45 = vpop.f32.mrf.mxu2  ;;  %v1475_v39 = vadd.f32 %v1474_v44, %v3177_v33 }
 0x3c2   :  { %v1525_v48 = vpop.f32.mrf.mxu0  ;;  %v1622_v47 = vadd.f32 %v1621_v45, %v3180_v50 }
 0x3c3   :  { %v1574_v6 = vpop.f32.mrf.mxu1  ;;  %v1526_v26 = vadd.f32 %v1525_v48, %v3169_v14  ;;  %v1731_v44 = vmax.f32 %v1475_v39, 0.0 }
 0x3c4   :  { %v1575_v28 = vadd.f32 %v1574_v6, %v3172_v42  ;;  %v1734_v63 = vmax.f32 %v1622_v47, 0.0 }
 0x3c5   :  { %v1740_v0 = vmax.f32 %v1526_v26, 0.0 }
 0x3c6   :  { %v1741_v48 = vmax.f32 %v1575_v28, 0.0  ;;  %v1959_v17 = vmax.f32 %v1958_v5, %v1734_v63 }
 0x3c7   :  { %v1934_v61 = vmax.f32 %v1933_v51, %v1740_v0 }
 0x3c8   :  { %v1476_v4 = vpop.f32.mrf.mxu3  ;;  %v1947_v52 = vmax.f32 %v1946_v54, %v1741_v48 }
 0x3c9   :  { %v1623_v15 = vpop.f32.mrf.mxu2  ;;  %v1477_v6 = vadd.f32 %v1476_v4, %v3177_v33 }
 0x3ca   :  { %v1528_v19 = vpop.f32.mrf.mxu0  ;;  %v1624_v56 = vadd.f32 %v1623_v15, %v3180_v50  ;;  %v1920_v15 = vmax.f32 %v1919_v57, %v1731_v44  ;;  %v2050_v57 = vld.sshfl [vmem:[#allocation1 + $0x8] sm:$0xff pattern:$0x73625140] }
 0x3cb   :  { %v1577_v23 = vpop.f32.mrf.mxu1  ;;  %v1529_v21 = vadd.f32 %v1528_v19, %v3169_v14  ;;  %v1739_v3 = vmax.f32 %v1477_v6, 0.0 }
 0x3cc   :  { %v1578_v37 = vadd.f32 %v1577_v23, %v3172_v42  ;;  %v1742_v7 = vmax.f32 %v1624_v56, 0.0 }
 0x3cd   :  { %v1748_v34 = vmax.f32 %v1529_v21, 0.0  ;;  %v1921_v20 = vmax.f32 %v1920_v15, %v1739_v3  ;;  %v2051_v3 = vld.sshfl [vmem:[#allocation1 + $0x10] sm:$0xff pattern:$0x73625140] }
 0x3ce   :  { %v1749_v11 = vmax.f32 %v1578_v37, 0.0  ;;  %v1960_v26 = vmax.f32 %v1959_v17, %v1742_v7 }
 0x3cf   :  { %v1935_v13 = vmax.f32 %v1934_v61, %v1748_v34 }
 0x3d0   :  { %v1479_v40 = vpop.f32.mrf.mxu3  ;;  %v1948_v8 = vmax.f32 %v1947_v52, %v1749_v11 }
 0x3d1   :  { %v1626_v2 = vpop.f32.mrf.mxu2  ;;  %v1480_v12 = vadd.f32 %v1479_v40, %v3177_v33 }
 0x3d2   :  { %v1530_v60 = vpop.f32.mrf.mxu0  ;;  %v1627_v55 = vadd.f32 %v1626_v2, %v3180_v50 }
 0x3d3   :  { %v1531_v45 = vadd.f32 %v1530_v60, %v3169_v14  ;;  %v1579_v62 = vpop.f32.mrf.mxu1  ;;  %v1747_v16 = vmax.f32 %v1480_v12, 0.0 }
 0x3d4   :  { %v1580_v1 = vadd.f32 %v1579_v62, %v3172_v42  ;;  %v1750_v14 = vmax.f32 %v1627_v55, 0.0  ;;  %v2049_v55 = vld.sshfl [vmem:[#allocation1] sm:$0xff pattern:$0x73625140] }
 0x3d5   :  { %v1756_v4 = vmax.f32 %v1531_v45, 0.0  ;;  %v1922_v25 = vmax.f32 %v1921_v20, %v1747_v16 }
 0x3d6   :  { %v1757_v9 = vmax.f32 %v1580_v1, 0.0  ;;  %v1961_v29 = vmax.f32 %v1960_v26, %v1750_v14 }
 0x3d7   :  { %v1936_v27 = vmax.f32 %v1935_v13, %v1756_v4  ;;  %v2052_v13 = vld.sshfl [vmem:[#allocation1 + $0x18] sm:$0xff pattern:$0x73625140]  ;;  %v2065_v4 = vpack.c.bf16 %v2050_v57, %v2049_v55 }
 0x3d8   :  { %v1949_v18 = vmax.f32 %v1948_v8, %v1757_v9  ;;  %v1481_v19 = vpop.f32.mrf.mxu3  ;;  %v2066_v5 = vpack.c.bf16 %v2052_v13, %v2051_v3 }
 0x3d9   :  { %v1937_v30 = vrot.slane %v1936_v27, 4  ;;  %v1482_v22 = vadd.f32 %v1481_v19, %v3177_v33  ;;  %v1628_v42 = vpop.f32.mrf.mxu2  ;;  %v2073_v7 = vrot.slane %v2065_v4, 3 }
 0x3da   :  { %v1950_v23 = vrot.slane %v1949_v18, 4  ;;  %v1629_v53 = vadd.f32 %v1628_v42, %v3180_v50  ;;  %v2074_v8 = vrot.slane %v2066_v5, 6  ;;  %v2075_v9 = vrot.slane %v2066_v5, 1 }
 0x3db   :  { %v1938_v10 = vmax.f32 %v1936_v27, %v1937_v30  ;;  %v1755_v28 = vmax.f32 %v1482_v22, 0.0  ;;  %v2083_v22 = vsel %vm2080_vm9, %v2065_v4, %v2073_v7 }
 0x3dc   :  { %v1951_v31 = vmax.f32 %v1949_v18, %v1950_v23  ;;  %v1758_v41 = vmax.f32 %v1629_v53, 0.0  ;;  %v2086_v42 = vsel %vm2012_vm8, %v2074_v8, %v2075_v9 }
 0x3dd   :  { %v1939_v21 = vrot.slane %v1938_v10, 2  ;;  %v1923_v32 = vmax.f32 %v1922_v25, %v1755_v28  ;;  %v2087_v53 = vsel %vm1997_vm1, %v2083_v22, %v2086_v42 }
 0x3de   :  { %v1952_v35 = vrot.slane %v1951_v31, 2  ;;  %v1962_v36 = vmax.f32 %v1961_v29, %v1758_v41 }
 0x3df   :  { %v1924_v37 = vrot.slane %v1923_v32, 4  ;;  %v1940_v38 = vmax.f32 %v1938_v10, %v1939_v21 }
 0x3e0   :  { %v1953_v24 = vmax.f32 %v1951_v31, %v1952_v35  ;;  %v1963_v39 = vrot.slane %v1962_v36, 4 }
 0x3e1   :  { %v1925_v33 = vmax.f32 %v1923_v32, %v1924_v37  ;;  %v1941_v46 = vrot.slane %v1940_v38, 1 }
 0x3e2   :  { %v1964_v0 = vmax.f32 %v1962_v36, %v1963_v39  ;;  %v1954_v47 = vrot.slane %v1953_v24, 1 }
 0x3e3   :  { %v1926_v43 = vrot.slane %v1925_v33, 2  ;;  %v1942_v51 = vmax.f32 %v1940_v38, %v1941_v46 }
 0x3e4   :  { %v1965_v50 = vrot.slane %v1964_v0, 2  ;;  %v1955_v6 = vmax.f32 %v1953_v24, %v1954_v47 }
 0x3e5   :  { %v1927_v48 = vmax.f32 %v1925_v33, %v1926_v43  ;;  %v1994_v54 = vrot.slane %v1942_v51, 6 }
 0x3e6   :  { %v1966_v40 = vmax.f32 %v1964_v0, %v1965_v50  ;;  %v1995_v56 = vrot.slane %v1955_v6, 4 }
 0x3e7   :  { %v1928_v49 = vrot.slane %v1927_v48, 1 }
 0x3e8   :  { %v1967_v34 = vrot.slane %v1966_v40, 1 }
 0x3e9   :  { %v1929_v2 = vmax.f32 %v1927_v48, %v1928_v49 }
 0x3ea   :  { %v1968_v58 = vmax.f32 %v1966_v40, %v1967_v34 }
 0x3eb   :  { %v2009_v60 = vsel %vm1997_vm1, %v1929_v2, %v1994_v54 }
 0x3ec   :  { %v1996_v11 = vrot.slane %v1968_v58, 2 }
 0x3ee   :  { %v2010_v44 = vsel %vm1999_vm2, %v1995_v56, %v1996_v11 }
 0x3ef   :  { %v2011_v61 = vsel %vm2001_vm3, %v2009_v60, %v2010_v44 }
 0x3f0   :  { %v2028_v12 = vrot.slane %v2011_v61, 7 }
 0x3f2   :  { %v2029_v45 = vsel %vm2018_vm4, %v2028_v12, %v3223_v59 }
 0x3f3   :  { %v2030_v62 = vsel %vm2020_vm5, %v2028_v12, %v2029_v45 }
 0x3f4   :  { %v2031_v63 = vsel %vm2022_vm6, %v2028_v12, %v2030_v62 }
 0x3f5   :  { %v2032_v52 = vsel %vm2024_vm7, %v2028_v12, %v2031_v63 }
 0x3f6   :  { %v2036_v1 = vmax.f32 %v2032_v52, 0.0 }
 0x3f8   :  { %2048 = vst [vmem:[#allocation1 + $0x20] ss:$4 sm:$0xff] %v2036_v1 }
 0x3ff   :  { %v2053_v59 = vld.sshfl [vmem:[#allocation1 + $0x20] sm:$0xff pattern:$0x73625140]  ;;  %v2054_v15 = vld.sshfl [vmem:[#allocation1 + $0x28] sm:$0xff pattern:$0x73625140] }
 0x400   :  { %v2055_v16 = vld.sshfl [vmem:[#allocation1 + $0x30] sm:$0xff pattern:$0x73625140]  ;;  %v2056_v27 = vld.sshfl [vmem:[#allocation1 + $0x38] sm:$0xff pattern:$0x73625140]  ;;  %v2067_v17 = vpack.c.bf16 %v2054_v15, %v2053_v59 }
 0x401   :  { %v2068_v14 = vpack.c.bf16 %v2056_v27, %v2055_v16 }
 0x402   :  { %v2076_v18 = vrot.slane %v2067_v17, 4  ;;  %v2077_v19 = vrot.slane %v2067_v17, 7 }
 0x403   :  { %v2078_v20 = vrot.slane %v2068_v14, 2  ;;  %v2079_v30 = vrot.slane %v2068_v14, 5 }
 0x404   :  { %v2090_v26 = vsel %vm2013_vm10, %v2076_v18, %v2077_v19 }
 0x405   :  { %v2093_v23 = vsel %vm2015_vm11, %v2078_v20, %v2079_v30 }
 0x406   :  { %v2094_v25 = vsel %vm1999_vm2, %v2090_v26, %v2093_v23 }
 0x407   :  { %v2095_v10 = vsel %vm2001_vm3, %v2087_v53, %v2094_v25 }
 0x408   :  { %2097 = vst [vmem:[#allocation6] sm:$0xff] %v2095_v10 }
 0x409   :  { %2108 = dma.vmem_to_hbm [thread:$0]  %s2104_s23, 128, %s2106_s2, [#allocation5]  }
 0x40a   :  { %2637 = dma.done.wait [#allocation5], 128  }
 0x40b   :  { %2638 = vsyncadd [#allocation5], 4294967168 }
 0x40c   :  { %2113 = vsyncpa [#allocation4], 1 }
 0x40d   :  { %2114 = vsyncpa [#allocation5], 1 }

</bundles_post_ra>
